<compile_context>
chip_gen: v5e
topology: v5e:2x2
jax: 0.10.0
libtpu: 0.0.40
codegen_flags: <defaults>
</compile_context>

<pallas_src>
import functools
import math

import jax
import jax.numpy as jnp
from jax.experimental import pallas as pl
from jax.experimental.pallas import tpu as pltpu


LEAKY_SLOPE = 0.2  # omnimatte ConvBlock: nn.LeakyReLU(0.2)
# TODO(synk): flip LEAKY_SLOPE to 0.01 if the target checkpoint used nn.LeakyReLU defaults.

# tap index i (or j) of a 4-wide stride-2 kernel dim with pad=1 maps to
# (pixel phase, plane offset):  input index 2*out + i - 1 == 2*(out + delta) + phase
_PHASE_TAP = ((1, -1), (0, 0), (1, 0), (0, 1))


# ----------------------------------------------------------------------------
# in-kernel helpers
# ----------------------------------------------------------------------------
def _lane_roll(x, off):
    """out[..., t] = x[..., (t + off) % n]  (static off; wrapped lanes are masked by caller)."""
    n = x.shape[-1]
    off %= n
    if off == 0:
        return x
    return jnp.concatenate([x[..., off:], x[..., :off]], axis=-1)


# ----------------------------------------------------------------------------
# Pallas kernel 1: stride-2 4x4 "same" conv as implicit GEMM over pixel phases
#   z_ref: (4, Cin, N) bf16 phase planes  (N = bg * Ho * Wo, batch on lanes)
#   w_ref: (16, Cout, Cin) bf16 per-tap weights;  b_ref: (Cout, 1) f32
#   m_ref: (9, N) bf16 shift-validity masks;      o_ref: (Cout, N) bf16
# ----------------------------------------------------------------------------
def _enc_kernel(z_ref, w_ref, b_ref, m_ref, o_ref, *, Wo, act):
    planes = [z_ref[k] for k in range(4)]          # each (Cin, N), loaded once
    acc = None
    for i in range(4):
        p, dh = _PHASE_TAP[i]
        for j in range(4):
            q, dw = _PHASE_TAP[j]
            opnd = _lane_roll(planes[2 * p + q], dh * Wo + dw)
            if dh != 0 or dw != 0:
                opnd = opnd * m_ref[pl.ds((dh + 1) * 3 + (dw + 1), 1), :]
            term = jnp.dot(w_ref[i * 4 + j], opnd,
                           preferred_element_type=jnp.float32)
            acc = term if acc is None else acc + term
    acc = acc + b_ref[...]                          # (Cout, 1) broadcast over lanes
    if act == "relu":
        acc = jnp.maximum(acc, 0.0)
    elif act == "leaky":
        acc = jnp.where(acc >= 0.0, acc, LEAKY_SLOPE * acc)
    o_ref[...] = acc.astype(o_ref.dtype)


# ----------------------------------------------------------------------------
# Pallas kernel 2: fused tail
#   key conv + value conv (3x3, pad 1) as one implicit GEMM (Cout concat),
#   then ctx = G @ query and the channel concat, all before a single store.
# ----------------------------------------------------------------------------
def _tail_kernel(x_ref, w_ref, b_ref, m_ref, g_ref, o_ref, *, keydim, valdim, W):
    x = x_ref[...]                                  # (C4, N) bf16
    acc = None
    for ki in range(3):
        for kj in range(3):
            dh, dw = ki - 1, kj - 1
            opnd = _lane_roll(x, dh * W + dw)
            if dh != 0 or dw != 0:
                opnd = opnd * m_ref[pl.ds(ki * 3 + kj, 1), :]
            term = jnp.dot(w_ref[ki * 3 + kj], opnd,
                           preferred_element_type=jnp.float32)
            acc = term if acc is None else acc + term
    kv = acc + b_ref[...]                           # (keydim+valdim, N) f32
    query = kv[:keydim, :].astype(jnp.bfloat16)
    value = kv[keydim:, :]
    ctx = jnp.dot(g_ref[...], query, preferred_element_type=jnp.float32)
    o_ref[:valdim, :] = ctx.astype(o_ref.dtype)
    o_ref[valdim:, :] = value.astype(o_ref.dtype)


# ----------------------------------------------------------------------------
# host-side layout glue (pure 1x layout passes, no data duplication)
# ----------------------------------------------------------------------------
def _pick_bg(batch, hw, cap_lanes=8192):
    """Largest divisor of batch whose collapsed lane width bg*hw stays under cap."""
    bg = 1
    for cand in range(1, batch + 1):
        if batch % cand == 0 and cand * hw <= cap_lanes:
            bg = cand
    return bg


def _build_masks(ho, wo, bg, dtype=jnp.bfloat16):
    """(9, bg*ho*wo) validity masks for shifts (dh, dw) in {-1,0,1}^2 (row = (dh+1)*3+(dw+1))."""
    hv = jnp.arange(ho)[:, None]
    wv = jnp.arange(wo)[None, :]
    rows = []
    for dh in (-1, 0, 1):
        for dw in (-1, 0, 1):
            m = ((hv + dh >= 0) & (hv + dh < ho) &
                 (wv + dw >= 0) & (wv + dw < wo))
            rows.append(jnp.tile(m.reshape(1, ho * wo), (1, bg)))
    return jnp.concatenate(rows, axis=0).astype(dtype)


def _to_phase_planes(x, bg):
    """(B, C, H, W) -> (G, 4, C, bg*Ho*Wo); plane = 2*h_phase + w_phase,
    lane = b_local*Ho*Wo + ho*Wo + wo."""
    b, c, h, w = x.shape
    ho, wo = h // 2, w // 2
    ng = b // bg
    z = x.reshape(ng, bg, c, ho, 2, wo, 2)
    z = z.transpose(0, 4, 6, 2, 1, 3, 5)            # (G, p, q, C, bg, Ho, Wo)
    return z.reshape(ng, 4, c, bg * ho * wo)


def _to_lanes(x, bg):
    b, c, h, w = x.shape
    ng = b // bg
    z = x.reshape(ng, bg, c, h * w).transpose(0, 2, 1, 3)
    return z.reshape(ng, c, bg * h * w)


def _from_lanes(y, bg, h, w):
    ng, c, _ = y.shape
    y = y.reshape(ng, c, bg, h, w).transpose(0, 2, 1, 3, 4)
    return y.reshape(ng * bg, c, h, w)


def same_pad(h, w, k, s, d=1):
    dh, dw = h // s, w // s
    py = 0.5 * (s * (dh - 1) + (k - 1) * (d - 1) + k - h)
    px = 0.5 * (s * (dw - 1) + (k - 1) * (d - 1) + k - w)
    return (int(math.floor(py)), int(math.ceil(py)),
            int(math.floor(px)), int(math.ceil(px)))


def fold_bn(w, b, bn):
    if bn is None:
        return w, b
    scale = bn["gamma"] / jnp.sqrt(bn["var"] + bn["eps"])
    return w * scale[:, None, None, None], (b - bn["mean"]) * scale + bn["beta"]


# ----------------------------------------------------------------------------
# layer wrappers
# ----------------------------------------------------------------------------
def encoder_conv(x, weight, bias, act):
    """stride-2 4x4 ConvBlock (same padding) + bias + activation; bf16 output (B, Cout, H/2, W/2)."""
    b, cin, h, w = x.shape
    cout = weight.shape[0]
    assert h % 2 == 0 and w % 2 == 0
    assert same_pad(h, w, 4, 2) == (1, 1, 1, 1)     # ConvBlock same-padding convention
    ho, wo = h // 2, w // 2
    bg = _pick_bg(b, ho * wo)
    ng = b // bg
    n = bg * ho * wo
    # TODO(synk): for very large spatial inputs, tile the lane axis with a halo instead of one block.

    z = _to_phase_planes(x.astype(jnp.bfloat16), bg)                 # (G, 4, Cin, N)
    w_taps = jnp.transpose(weight, (2, 3, 0, 1)).reshape(16, cout, cin).astype(jnp.bfloat16)
    masks = _build_masks(ho, wo, bg)

    out = pl.pallas_call(
        functools.partial(_enc_kernel, Wo=wo, act=act),
        out_shape=jax.ShapeDtypeStruct((ng, cout, n), jnp.bfloat16),
        grid=(ng,),
        in_specs=[
            pl.BlockSpec((None, 4, cin, n), lambda i: (i, 0, 0, 0)),
            pl.BlockSpec((16, cout, cin), lambda i: (0, 0, 0)),
            pl.BlockSpec((cout, 1), lambda i: (0, 0)),
            pl.BlockSpec((9, n), lambda i: (0, 0)),
        ],
        out_specs=pl.BlockSpec((None, cout, n), lambda i: (i, 0, 0)),
        compiler_params=pltpu.CompilerParams(
            dimension_semantics=("parallel",)),
    )(z, w_taps, bias.reshape(cout, 1).astype(jnp.float32), masks)
    return _from_lanes(out, bg, ho, wo)


def tail_fused(x, key_w, key_b, val_w, val_b, g_ctx):
    """3x3 pad-1 key/value convs + context read (G @ query) + concat -> (B, 2*valdim, H, W) f32."""
    b, c4, h, w = x.shape
    keydim, valdim = key_w.shape[0], val_w.shape[0]
    ckv = keydim + valdim
    bg = _pick_bg(b, h * w)
    ng = b // bg
    n = bg * h * w

    xz = _to_lanes(x.astype(jnp.bfloat16), bg)                       # (G, C4, N)
    wkv = jnp.concatenate([key_w, val_w], axis=0)                    # (Ckv, C4, 3, 3)
    wkv_taps = jnp.transpose(wkv, (2, 3, 0, 1)).reshape(9, ckv, c4).astype(jnp.bfloat16)
    bkv = jnp.concatenate([key_b, val_b], axis=0).reshape(ckv, 1).astype(jnp.float32)
    masks = _build_masks(h, w, bg)

    out = pl.pallas_call(
        functools.partial(_tail_kernel, keydim=keydim, valdim=valdim, W=w),
        out_shape=jax.ShapeDtypeStruct((ng, 2 * valdim, n), jnp.float32),
        grid=(ng,),
        in_specs=[
            pl.BlockSpec((None, c4, n), lambda i: (i, 0, 0)),
            pl.BlockSpec((9, ckv, c4), lambda i: (0, 0, 0)),
            pl.BlockSpec((ckv, 1), lambda i: (0, 0)),
            pl.BlockSpec((9, n), lambda i: (0, 0)),
            pl.BlockSpec((valdim, keydim), lambda i: (0, 0)),
        ],
        out_specs=pl.BlockSpec((None, 2 * valdim, n), lambda i: (i, 0, 0)),
        compiler_params=pltpu.CompilerParams(
            dimension_semantics=("parallel",)),
    )(xz, wkv_taps, bkv, masks, g_ctx.astype(jnp.bfloat16))
    return _from_lanes(out, bg, h, w)


# ----------------------------------------------------------------------------
# Parameter init (deterministic, PyTorch-like uniform fan-in init)
# ----------------------------------------------------------------------------
def init_conv(key, cout, cin, k):
    kw_, kb_ = jax.random.split(key)
    bound = 1.0 / math.sqrt(cin * k * k)
    w = jax.random.uniform(kw_, (cout, cin, k, k), jnp.float32, -bound, bound)
    b = jax.random.uniform(kb_, (cout,), jnp.float32, -bound, bound)
    return w, b


def default_bn(c):
    return dict(gamma=jnp.ones((c,), jnp.float32),
                beta=jnp.zeros((c,), jnp.float32),
                mean=jnp.zeros((c,), jnp.float32),
                var=jnp.ones((c,), jnp.float32),
                eps=1e-5)


def init_memory_reader(key, in_channels, conv_channels, keydim, valdim):
    ks = jax.random.split(key, 7)
    cc = conv_channels
    enc_cfg = [(in_channels, cc, None, "relu"),
               (cc, cc * 2, "bn", "leaky"),
               (cc * 2, cc * 4, "bn", "leaky"),
               (cc * 4, cc * 4, "bn", "leaky")]
    enc = []
    for i, (ci, co, norm, act) in enumerate(enc_cfg):
        w, b = init_conv(ks[i], co, ci, 4)
        enc.append(dict(w=w, b=b, bn=default_bn(co) if norm else None, act=act))
    key_w, key_b = init_conv(ks[4], keydim, cc * 4, 3)
    val_w, val_b = init_conv(ks[5], valdim, cc * 4, 3)
    # PyTorch buffer starts as zeros; fill with random values as if updated by
    # GlobalContextVolume.update() so the test is meaningful.
    ctx = jax.random.normal(ks[6], (valdim, keydim), jnp.float32) * 0.1
    return dict(enc=enc, key=(key_w, key_b), val=(val_w, val_b),
                context_volume=ctx)


# ----------------------------------------------------------------------------
# MemoryReader forward (Pallas path)
# ----------------------------------------------------------------------------
def memory_reader_forward(params, x):
    skips = []
    for layer in params["enc"]:
        w, b = fold_bn(layer["w"], layer["b"], layer["bn"])   # eval-mode BN fold
        x = encoder_conv(x, w, b, layer["act"])               # bf16 skip / next input
        skips.append(x)
    key_w, key_b = params["key"]
    val_w, val_b = params["val"]
    feature_map = tail_fused(x, key_w, key_b, val_w, val_b, params["context_volume"])
    return feature_map, skips


# ----------------------------------------------------------------------------
# Pure-JAX reference (mirrors the kernel numerics: bf16 MXU inputs, f32 accum,
# bf16 storage of encoder activations)
# ----------------------------------------------------------------------------
def _conv_ref(x, w, b, stride, pad):
    y = jax.lax.conv_general_dilated(
        x.astype(jnp.bfloat16), w.astype(jnp.bfloat16),
        window_strides=(stride, stride),
        padding=((pad[0], pad[1]), (pad[2], pad[3])),
        dimension_numbers=("NCHW", "OIHW", "NCHW"),
        preferred_element_type=jnp.float32)
    return y + b[None, :, None, None]


def memory_reader_forward_ref(params, x):
    skips = []
    for layer in params["enc"]:
        w, b = fold_bn(layer["w"], layer["b"], layer["bn"])
        pad = same_pad(x.shape[2], x.shape[3], 4, 2)
        y = _conv_ref(x, w, b, 2, pad)
        y = jnp.maximum(y, 0.0) if layer["act"] == "relu" \
            else jnp.where(y >= 0, y, LEAKY_SLOPE * y)
        x = y.astype(jnp.bfloat16)
        skips.append(x)
    query = _conv_ref(x, *params["key"], 1, (1, 1, 1, 1))
    value = _conv_ref(x, *params["val"], 1, (1, 1, 1, 1))
    bb, ck, hh, ww = query.shape
    gmat = params["context_volume"].astype(jnp.bfloat16)
    q = query.reshape(bb, ck, hh * ww).astype(jnp.bfloat16)
    ctx = jnp.matmul(gmat, q, preferred_element_type=jnp.float32).reshape(bb, -1, hh, ww)
    return jnp.concatenate([ctx, value], axis=1), skips


# ----------------------------------------------------------------------------
if __name__ == "__main__":
    B, in_channels, conv_channels, keydim, valdim = 2, 4, 8, 8, 8
    H = W = 32                                  # -> query/value spatial 2x2

    root = jax.random.PRNGKey(0)
    kp, kx = jax.random.split(root)
    params = init_memory_reader(kp, in_channels, conv_channels, keydim, valdim)
    x = jax.random.normal(kx, (B, in_channels, H, W), jnp.float32)

    feature_map, skips = memory_reader_forward(params, x)
    feature_map = jax.block_until_ready(feature_map)

    ref_fm, ref_skips = memory_reader_forward_ref(params, x)
    assert feature_map.shape == (B, 2 * valdim, H // 16, W // 16), feature_map.shape
    assert jnp.allclose(feature_map, ref_fm, atol=2e-2, rtol=2e-2), \
        float(jnp.max(jnp.abs(feature_map - ref_fm)))
    for s, rs in zip(skips, ref_skips):
        s32, rs32 = s.astype(jnp.float32), rs.astype(jnp.float32)
        assert jnp.allclose(s32, rs32, atol=2e-2, rtol=2e-2), \
            float(jnp.max(jnp.abs(s32 - rs32)))

    print("KERNEL_OK")
</pallas_src>

<mosaic_0001>
module attributes {stable_mosaic.version = 11 : i64} {
  func.func @_enc_kernel(%arg0: i32, %arg1: memref<1x4x4x512xbf16, #tpu.memory_space<vmem>>, %arg2: memref<16x8x4xbf16, #tpu.memory_space<vmem>>, %arg3: memref<8x1xf32, #tpu.memory_space<vmem>>, %arg4: memref<9x512xbf16, #tpu.memory_space<vmem>>, %arg5: memref<1x8x512xbf16, #tpu.memory_space<vmem>>) attributes {dimension_semantics = [#tpu.dimension_semantics<parallel>], iteration_bounds = array<i64: 1>, scalar_prefetch = 0 : i64, scratch_operands = 0 : i64, tpu.core_type = #tpu.core_type<tc>, window_params = [{transform_indices = @transform_0, window_bounds = array<i64: 1, 4, 4, 512>}, {pipeline_mode = #tpu.pipeline_mode<synchronous>, transform_indices = @transform_1, window_bounds = array<i64: 16, 8, 4>}, {pipeline_mode = #tpu.pipeline_mode<synchronous>, transform_indices = @transform_2, window_bounds = array<i64: 8, 1>}, {pipeline_mode = #tpu.pipeline_mode<synchronous>, transform_indices = @transform_3, window_bounds = array<i64: 9, 512>}, {transform_indices = @transform_4, window_bounds = array<i64: 1, 8, 512>}]} {
    %c0 = arith.constant 0 : index
    %c0_0 = arith.constant 0 : index
    %c0_1 = arith.constant 0 : index
    %c0_2 = arith.constant 0 : index
    %0 = vector.load %arg1[%c0, %c0_0, %c0_1, %c0_2] : memref<1x4x4x512xbf16, #tpu.memory_space<vmem>>, vector<1x1x4x512xbf16>
    %1 = vector.shape_cast %0 : vector<1x1x4x512xbf16> to vector<4x512xbf16>
    %c0_3 = arith.constant 0 : index
    %c1 = arith.constant 1 : index
    %c0_4 = arith.constant 0 : index
    %c0_5 = arith.constant 0 : index
    %2 = vector.load %arg1[%c0_3, %c1, %c0_4, %c0_5] : memref<1x4x4x512xbf16, #tpu.memory_space<vmem>>, vector<1x1x4x512xbf16>
    %3 = vector.shape_cast %2 : vector<1x1x4x512xbf16> to vector<4x512xbf16>
    %c0_6 = arith.constant 0 : index
    %c2 = arith.constant 2 : index
    %c0_7 = arith.constant 0 : index
    %c0_8 = arith.constant 0 : index
    %4 = vector.load %arg1[%c0_6, %c2, %c0_7, %c0_8] : memref<1x4x4x512xbf16, #tpu.memory_space<vmem>>, vector<1x1x4x512xbf16>
    %5 = vector.shape_cast %4 : vector<1x1x4x512xbf16> to vector<4x512xbf16>
    %c0_9 = arith.constant 0 : index
    %c3 = arith.constant 3 : index
    %c0_10 = arith.constant 0 : index
    %c0_11 = arith.constant 0 : index
    %6 = vector.load %arg1[%c0_9, %c3, %c0_10, %c0_11] : memref<1x4x4x512xbf16, #tpu.memory_space<vmem>>, vector<1x1x4x512xbf16>
    %7 = vector.shape_cast %6 : vector<1x1x4x512xbf16> to vector<4x512xbf16>
    %8 = vector.extract_strided_slice %7 {offsets = [0, 495], sizes = [4, 17], strides = [1, 1]} : vector<4x512xbf16> to vector<4x17xbf16>
    %9 = vector.extract_strided_slice %7 {offsets = [0, 0], sizes = [4, 495], strides = [1, 1]} : vector<4x512xbf16> to vector<4x495xbf16>
    %10 = tpu.concatenate %8, %9 in 1 : vector<4x17xbf16>, vector<4x495xbf16> -> vector<4x512xbf16>
    %c0_12 = arith.constant 0 : index
    %c0_13 = arith.constant 0 : index
    %11 = vector.load %arg4[%c0_12, %c0_13] : memref<9x512xbf16, #tpu.memory_space<vmem>>, vector<1x512xbf16>
    %12 = vector.broadcast %11 : vector<1x512xbf16> to vector<4x512xbf16>
    %13 = arith.mulf %10, %12 : vector<4x512xbf16>
    %c0_14 = arith.constant 0 : index
    %c0_15 = arith.constant 0 : index
    %c0_16 = arith.constant 0 : index
    %14 = vector.load %arg2[%c0_14, %c0_15, %c0_16] : memref<16x8x4xbf16, #tpu.memory_space<vmem>>, vector<1x8x4xbf16>
    %15 = vector.shape_cast %14 : vector<1x8x4xbf16> to vector<8x4xbf16>
    %cst = arith.constant dense<0.000000e+00> : vector<8x512xf32>
    %16 = tpu.matmul %15, %13, %cst {dimension_numbers = #tpu.dot_dimension_numbers<[1], [0], [0], [1], [0, 0, 1, 1], [], []>} : vector<8x4xbf16>, vector<4x512xbf16>, vector<8x512xf32> -> vector<8x512xf32>
    %17 = vector.extract_strided_slice %5 {offsets = [0, 496], sizes = [4, 16], strides = [1, 1]} : vector<4x512xbf16> to vector<4x16xbf16>
    %18 = vector.extract_strided_slice %5 {offsets = [0, 0], sizes = [4, 496], strides = [1, 1]} : vector<4x512xbf16> to vector<4x496xbf16>
    %19 = tpu.concatenate %17, %18 in 1 : vector<4x16xbf16>, vector<4x496xbf16> -> vector<4x512xbf16>
    %c1_17 = arith.constant 1 : index
    %c0_18 = arith.constant 0 : index
    %20 = vector.load %arg4[%c1_17, %c0_18] : memref<9x512xbf16, #tpu.memory_space<vmem>>, vector<1x512xbf16>
    %21 = vector.broadcast %20 : vector<1x512xbf16> to vector<4x512xbf16>
    %22 = arith.mulf %19, %21 : vector<4x512xbf16>
    %c1_19 = arith.constant 1 : index
    %c0_20 = arith.constant 0 : index
    %c0_21 = arith.constant 0 : index
    %23 = vector.load %arg2[%c1_19, %c0_20, %c0_21] : memref<16x8x4xbf16, #tpu.memory_space<vmem>>, vector<1x8x4xbf16>
    %24 = vector.shape_cast %23 : vector<1x8x4xbf16> to vector<8x4xbf16>
    %cst_22 = arith.constant dense<0.000000e+00> : vector<8x512xf32>
    %25 = tpu.matmul %24, %22, %cst_22 {dimension_numbers = #tpu.dot_dimension_numbers<[1], [0], [0], [1], [0, 0, 1, 1], [], []>} : vector<8x4xbf16>, vector<4x512xbf16>, vector<8x512xf32> -> vector<8x512xf32>
    %26 = arith.addf %16, %25 : vector<8x512xf32>
    %27 = vector.extract_strided_slice %7 {offsets = [0, 496], sizes = [4, 16], strides = [1, 1]} : vector<4x512xbf16> to vector<4x16xbf16>
    %28 = vector.extract_strided_slice %7 {offsets = [0, 0], sizes = [4, 496], strides = [1, 1]} : vector<4x512xbf16> to vector<4x496xbf16>
    %29 = tpu.concatenate %27, %28 in 1 : vector<4x16xbf16>, vector<4x496xbf16> -> vector<4x512xbf16>
    %c1_23 = arith.constant 1 : index
    %c0_24 = arith.constant 0 : index
    %30 = vector.load %arg4[%c1_23, %c0_24] : memref<9x512xbf16, #tpu.memory_space<vmem>>, vector<1x512xbf16>
    %31 = vector.broadcast %30 : vector<1x512xbf16> to vector<4x512xbf16>
    %32 = arith.mulf %29, %31 : vector<4x512xbf16>
    %c2_25 = arith.constant 2 : index
    %c0_26 = arith.constant 0 : index
    %c0_27 = arith.constant 0 : index
    %33 = vector.load %arg2[%c2_25, %c0_26, %c0_27] : memref<16x8x4xbf16, #tpu.memory_space<vmem>>, vector<1x8x4xbf16>
    %34 = vector.shape_cast %33 : vector<1x8x4xbf16> to vector<8x4xbf16>
    %cst_28 = arith.constant dense<0.000000e+00> : vector<8x512xf32>
    %35 = tpu.matmul %34, %32, %cst_28 {dimension_numbers = #tpu.dot_dimension_numbers<[1], [0], [0], [1], [0, 0, 1, 1], [], []>} : vector<8x4xbf16>, vector<4x512xbf16>, vector<8x512xf32> -> vector<8x512xf32>
    %36 = arith.addf %26, %35 : vector<8x512xf32>
    %37 = vector.extract_strided_slice %5 {offsets = [0, 497], sizes = [4, 15], strides = [1, 1]} : vector<4x512xbf16> to vector<4x15xbf16>
    %38 = vector.extract_strided_slice %5 {offsets = [0, 0], sizes = [4, 497], strides = [1, 1]} : vector<4x512xbf16> to vector<4x497xbf16>
    %39 = tpu.concatenate %37, %38 in 1 : vector<4x15xbf16>, vector<4x497xbf16> -> vector<4x512xbf16>
    %c2_29 = arith.constant 2 : index
    %c0_30 = arith.constant 0 : index
    %40 = vector.load %arg4[%c2_29, %c0_30] : memref<9x512xbf16, #tpu.memory_space<vmem>>, vector<1x512xbf16>
    %41 = vector.broadcast %40 : vector<1x512xbf16> to vector<4x512xbf16>
    %42 = arith.mulf %39, %41 : vector<4x512xbf16>
    %c3_31 = arith.constant 3 : index
    %c0_32 = arith.constant 0 : index
    %c0_33 = arith.constant 0 : index
    %43 = vector.load %arg2[%c3_31, %c0_32, %c0_33] : memref<16x8x4xbf16, #tpu.memory_space<vmem>>, vector<1x8x4xbf16>
    %44 = vector.shape_cast %43 : vector<1x8x4xbf16> to vector<8x4xbf16>
    %cst_34 = arith.constant dense<0.000000e+00> : vector<8x512xf32>
    %45 = tpu.matmul %44, %42, %cst_34 {dimension_numbers = #tpu.dot_dimension_numbers<[1], [0], [0], [1], [0, 0, 1, 1], [], []>} : vector<8x4xbf16>, vector<4x512xbf16>, vector<8x512xf32> -> vector<8x512xf32>
    %46 = arith.addf %36, %45 : vector<8x512xf32>
    %47 = vector.extract_strided_slice %3 {offsets = [0, 511], sizes = [4, 1], strides = [1, 1]} : vector<4x512xbf16> to vector<4x1xbf16>
    %48 = vector.extract_strided_slice %3 {offsets = [0, 0], sizes = [4, 511], strides = [1, 1]} : vector<4x512xbf16> to vector<4x511xbf16>
    %49 = tpu.concatenate %47, %48 in 1 : vector<4x1xbf16>, vector<4x511xbf16> -> vector<4x512xbf16>
    %c3_35 = arith.constant 3 : index
    %c0_36 = arith.constant 0 : index
    %50 = vector.load %arg4[%c3_35, %c0_36] : memref<9x512xbf16, #tpu.memory_space<vmem>>, vector<1x512xbf16>
    %51 = vector.broadcast %50 : vector<1x512xbf16> to vector<4x512xbf16>
    %52 = arith.mulf %49, %51 : vector<4x512xbf16>
    %c4 = arith.constant 4 : index
    %c0_37 = arith.constant 0 : index
    %c0_38 = arith.constant 0 : index
    %53 = vector.load %arg2[%c4, %c0_37, %c0_38] : memref<16x8x4xbf16, #tpu.memory_space<vmem>>, vector<1x8x4xbf16>
    %54 = vector.shape_cast %53 : vector<1x8x4xbf16> to vector<8x4xbf16>
    %cst_39 = arith.constant dense<0.000000e+00> : vector<8x512xf32>
    %55 = tpu.matmul %54, %52, %cst_39 {dimension_numbers = #tpu.dot_dimension_numbers<[1], [0], [0], [1], [0, 0, 1, 1], [], []>} : vector<8x4xbf16>, vector<4x512xbf16>, vector<8x512xf32> -> vector<8x512xf32>
    %56 = arith.addf %46, %55 : vector<8x512xf32>
    %c5 = arith.constant 5 : index
    %c0_40 = arith.constant 0 : index
    %c0_41 = arith.constant 0 : index
    %57 = vector.load %arg2[%c5, %c0_40, %c0_41] : memref<16x8x4xbf16, #tpu.memory_space<vmem>>, vector<1x8x4xbf16>
    %58 = vector.shape_cast %57 : vector<1x8x4xbf16> to vector<8x4xbf16>
    %cst_42 = arith.constant dense<0.000000e+00> : vector<8x512xf32>
    %59 = tpu.matmul %58, %1, %cst_42 {dimension_numbers = #tpu.dot_dimension_numbers<[1], [0], [0], [1], [0, 0, 1, 1], [], []>} : vector<8x4xbf16>, vector<4x512xbf16>, vector<8x512xf32> -> vector<8x512xf32>
    %60 = arith.addf %56, %59 : vector<8x512xf32>
    %c6 = arith.constant 6 : index
    %c0_43 = arith.constant 0 : index
    %c0_44 = arith.constant 0 : index
    %61 = vector.load %arg2[%c6, %c0_43, %c0_44] : memref<16x8x4xbf16, #tpu.memory_space<vmem>>, vector<1x8x4xbf16>
    %62 = vector.shape_cast %61 : vector<1x8x4xbf16> to vector<8x4xbf16>
    %cst_45 = arith.constant dense<0.000000e+00> : vector<8x512xf32>
    %63 = tpu.matmul %62, %3, %cst_45 {dimension_numbers = #tpu.dot_dimension_numbers<[1], [0], [0], [1], [0, 0, 1, 1], [], []>} : vector<8x4xbf16>, vector<4x512xbf16>, vector<8x512xf32> -> vector<8x512xf32>
    %64 = arith.addf %60, %63 : vector<8x512xf32>
    %65 = vector.extract_strided_slice %1 {offsets = [0, 1], sizes = [4, 511], strides = [1, 1]} : vector<4x512xbf16> to vector<4x511xbf16>
    %66 = vector.extract_strided_slice %1 {offsets = [0, 0], sizes = [4, 1], strides = [1, 1]} : vector<4x512xbf16> to vector<4x1xbf16>
    %67 = tpu.concatenate %65, %66 in 1 : vector<4x511xbf16>, vector<4x1xbf16> -> vector<4x512xbf16>
    %c5_46 = arith.constant 5 : index
    %c0_47 = arith.constant 0 : index
    %68 = vector.load %arg4[%c5_46, %c0_47] : memref<9x512xbf16, #tpu.memory_space<vmem>>, vector<1x512xbf16>
    %69 = vector.broadcast %68 : vector<1x512xbf16> to vector<4x512xbf16>
    %70 = arith.mulf %67, %69 : vector<4x512xbf16>
    %c7 = arith.constant 7 : index
    %c0_48 = arith.constant 0 : index
    %c0_49 = arith.constant 0 : index
    %71 = vector.load %arg2[%c7, %c0_48, %c0_49] : memref<16x8x4xbf16, #tpu.memory_space<vmem>>, vector<1x8x4xbf16>
    %72 = vector.shape_cast %71 : vector<1x8x4xbf16> to vector<8x4xbf16>
    %cst_50 = arith.constant dense<0.000000e+00> : vector<8x512xf32>
    %73 = tpu.matmul %72, %70, %cst_50 {dimension_numbers = #tpu.dot_dimension_numbers<[1], [0], [0], [1], [0, 0, 1, 1], [], []>} : vector<8x4xbf16>, vector<4x512xbf16>, vector<8x512xf32> -> vector<8x512xf32>
    %74 = arith.addf %64, %73 : vector<8x512xf32>
    %75 = vector.extract_strided_slice %7 {offsets = [0, 511], sizes = [4, 1], strides = [1, 1]} : vector<4x512xbf16> to vector<4x1xbf16>
    %76 = vector.extract_strided_slice %7 {offsets = [0, 0], sizes = [4, 511], strides = [1, 1]} : vector<4x512xbf16> to vector<4x511xbf16>
    %77 = tpu.concatenate %75, %76 in 1 : vector<4x1xbf16>, vector<4x511xbf16> -> vector<4x512xbf16>
    %c3_51 = arith.constant 3 : index
    %c0_52 = arith.constant 0 : index
    %78 = vector.load %arg4[%c3_51, %c0_52] : memref<9x512xbf16, #tpu.memory_space<vmem>>, vector<1x512xbf16>
    %79 = vector.broadcast %78 : vector<1x512xbf16> to vector<4x512xbf16>
    %80 = arith.mulf %77, %79 : vector<4x512xbf16>
    %c8 = arith.constant 8 : index
    %c0_53 = arith.constant 0 : index
    %c0_54 = arith.constant 0 : index
    %81 = vector.load %arg2[%c8, %c0_53, %c0_54] : memref<16x8x4xbf16, #tpu.memory_space<vmem>>, vector<1x8x4xbf16>
    %82 = vector.shape_cast %81 : vector<1x8x4xbf16> to vector<8x4xbf16>
    %cst_55 = arith.constant dense<0.000000e+00> : vector<8x512xf32>
    %83 = tpu.matmul %82, %80, %cst_55 {dimension_numbers = #tpu.dot_dimension_numbers<[1], [0], [0], [1], [0, 0, 1, 1], [], []>} : vector<8x4xbf16>, vector<4x512xbf16>, vector<8x512xf32> -> vector<8x512xf32>
    %84 = arith.addf %74, %83 : vector<8x512xf32>
    %c9 = arith.constant 9 : index
    %c0_56 = arith.constant 0 : index
    %c0_57 = arith.constant 0 : index
    %85 = vector.load %arg2[%c9, %c0_56, %c0_57] : memref<16x8x4xbf16, #tpu.memory_space<vmem>>, vector<1x8x4xbf16>
    %86 = vector.shape_cast %85 : vector<1x8x4xbf16> to vector<8x4xbf16>
    %cst_58 = arith.constant dense<0.000000e+00> : vector<8x512xf32>
    %87 = tpu.matmul %86, %5, %cst_58 {dimension_numbers = #tpu.dot_dimension_numbers<[1], [0], [0], [1], [0, 0, 1, 1], [], []>} : vector<8x4xbf16>, vector<4x512xbf16>, vector<8x512xf32> -> vector<8x512xf32>
    %88 = arith.addf %84, %87 : vector<8x512xf32>
    %c10 = arith.constant 10 : index
    %c0_59 = arith.constant 0 : index
    %c0_60 = arith.constant 0 : index
    %89 = vector.load %arg2[%c10, %c0_59, %c0_60] : memref<16x8x4xbf16, #tpu.memory_space<vmem>>, vector<1x8x4xbf16>
    %90 = vector.shape_cast %89 : vector<1x8x4xbf16> to vector<8x4xbf16>
    %cst_61 = arith.constant dense<0.000000e+00> : vector<8x512xf32>
    %91 = tpu.matmul %90, %7, %cst_61 {dimension_numbers = #tpu.dot_dimension_numbers<[1], [0], [0], [1], [0, 0, 1, 1], [], []>} : vector<8x4xbf16>, vector<4x512xbf16>, vector<8x512xf32> -> vector<8x512xf32>
    %92 = arith.addf %88, %91 : vector<8x512xf32>
    %93 = vector.extract_strided_slice %5 {offsets = [0, 1], sizes = [4, 511], strides = [1, 1]} : vector<4x512xbf16> to vector<4x511xbf16>
    %94 = vector.extract_strided_slice %5 {offsets = [0, 0], sizes = [4, 1], strides = [1, 1]} : vector<4x512xbf16> to vector<4x1xbf16>
    %95 = tpu.concatenate %93, %94 in 1 : vector<4x511xbf16>, vector<4x1xbf16> -> vector<4x512xbf16>
    %c5_62 = arith.constant 5 : index
    %c0_63 = arith.constant 0 : index
    %96 = vector.load %arg4[%c5_62, %c0_63] : memref<9x512xbf16, #tpu.memory_space<vmem>>, vector<1x512xbf16>
    %97 = vector.broadcast %96 : vector<1x512xbf16> to vector<4x512xbf16>
    %98 = arith.mulf %95, %97 : vector<4x512xbf16>
    %c11 = arith.constant 11 : index
    %c0_64 = arith.constant 0 : index
    %c0_65 = arith.constant 0 : index
    %99 = vector.load %arg2[%c11, %c0_64, %c0_65] : memref<16x8x4xbf16, #tpu.memory_space<vmem>>, vector<1x8x4xbf16>
    %100 = vector.shape_cast %99 : vector<1x8x4xbf16> to vector<8x4xbf16>
    %cst_66 = arith.constant dense<0.000000e+00> : vector<8x512xf32>
    %101 = tpu.matmul %100, %98, %cst_66 {dimension_numbers = #tpu.dot_dimension_numbers<[1], [0], [0], [1], [0, 0, 1, 1], [], []>} : vector<8x4xbf16>, vector<4x512xbf16>, vector<8x512xf32> -> vector<8x512xf32>
    %102 = arith.addf %92, %101 : vector<8x512xf32>
    %103 = vector.extract_strided_slice %3 {offsets = [0, 15], sizes = [4, 497], strides = [1, 1]} : vector<4x512xbf16> to vector<4x497xbf16>
    %104 = vector.extract_strided_slice %3 {offsets = [0, 0], sizes = [4, 15], strides = [1, 1]} : vector<4x512xbf16> to vector<4x15xbf16>
    %105 = tpu.concatenate %103, %104 in 1 : vector<4x497xbf16>, vector<4x15xbf16> -> vector<4x512xbf16>
    %c6_67 = arith.constant 6 : index
    %c0_68 = arith.constant 0 : index
    %106 = vector.load %arg4[%c6_67, %c0_68] : memref<9x512xbf16, #tpu.memory_space<vmem>>, vector<1x512xbf16>
    %107 = vector.broadcast %106 : vector<1x512xbf16> to vector<4x512xbf16>
    %108 = arith.mulf %105, %107 : vector<4x512xbf16>
    %c12 = arith.constant 12 : index
    %c0_69 = arith.constant 0 : index
    %c0_70 = arith.constant 0 : index
    %109 = vector.load %arg2[%c12, %c0_69, %c0_70] : memref<16x8x4xbf16, #tpu.memory_space<vmem>>, vector<1x8x4xbf16>
    %110 = vector.shape_cast %109 : vector<1x8x4xbf16> to vector<8x4xbf16>
    %cst_71 = arith.constant dense<0.000000e+00> : vector<8x512xf32>
    %111 = tpu.matmul %110, %108, %cst_71 {dimension_numbers = #tpu.dot_dimension_numbers<[1], [0], [0], [1], [0, 0, 1, 1], [], []>} : vector<8x4xbf16>, vector<4x512xbf16>, vector<8x512xf32> -> vector<8x512xf32>
    %112 = arith.addf %102, %111 : vector<8x512xf32>
    %113 = vector.extract_strided_slice %1 {offsets = [0, 16], sizes = [4, 496], strides = [1, 1]} : vector<4x512xbf16> to vector<4x496xbf16>
    %114 = vector.extract_strided_slice %1 {offsets = [0, 0], sizes = [4, 16], strides = [1, 1]} : vector<4x512xbf16> to vector<4x16xbf16>
    %115 = tpu.concatenate %113, %114 in 1 : vector<4x496xbf16>, vector<4x16xbf16> -> vector<4x512xbf16>
    %c7_72 = arith.constant 7 : index
    %c0_73 = arith.constant 0 : index
    %116 = vector.load %arg4[%c7_72, %c0_73] : memref<9x512xbf16, #tpu.memory_space<vmem>>, vector<1x512xbf16>
    %117 = vector.broadcast %116 : vector<1x512xbf16> to vector<4x512xbf16>
    %118 = arith.mulf %115, %117 : vector<4x512xbf16>
    %c13 = arith.constant 13 : index
    %c0_74 = arith.constant 0 : index
    %c0_75 = arith.constant 0 : index
    %119 = vector.load %arg2[%c13, %c0_74, %c0_75] : memref<16x8x4xbf16, #tpu.memory_space<vmem>>, vector<1x8x4xbf16>
    %120 = vector.shape_cast %119 : vector<1x8x4xbf16> to vector<8x4xbf16>
    %cst_76 = arith.constant dense<0.000000e+00> : vector<8x512xf32>
    %121 = tpu.matmul %120, %118, %cst_76 {dimension_numbers = #tpu.dot_dimension_numbers<[1], [0], [0], [1], [0, 0, 1, 1], [], []>} : vector<8x4xbf16>, vector<4x512xbf16>, vector<8x512xf32> -> vector<8x512xf32>
    %122 = arith.addf %112, %121 : vector<8x512xf32>
    %123 = vector.extract_strided_slice %3 {offsets = [0, 16], sizes = [4, 496], strides = [1, 1]} : vector<4x512xbf16> to vector<4x496xbf16>
    %124 = vector.extract_strided_slice %3 {offsets = [0, 0], sizes = [4, 16], strides = [1, 1]} : vector<4x512xbf16> to vector<4x16xbf16>
    %125 = tpu.concatenate %123, %124 in 1 : vector<4x496xbf16>, vector<4x16xbf16> -> vector<4x512xbf16>
    %c7_77 = arith.constant 7 : index
    %c0_78 = arith.constant 0 : index
    %126 = vector.load %arg4[%c7_77, %c0_78] : memref<9x512xbf16, #tpu.memory_space<vmem>>, vector<1x512xbf16>
    %127 = vector.broadcast %126 : vector<1x512xbf16> to vector<4x512xbf16>
    %128 = arith.mulf %125, %127 : vector<4x512xbf16>
    %c14 = arith.constant 14 : index
    %c0_79 = arith.constant 0 : index
    %c0_80 = arith.constant 0 : index
    %129 = vector.load %arg2[%c14, %c0_79, %c0_80] : memref<16x8x4xbf16, #tpu.memory_space<vmem>>, vector<1x8x4xbf16>
    %130 = vector.shape_cast %129 : vector<1x8x4xbf16> to vector<8x4xbf16>
    %cst_81 = arith.constant dense<0.000000e+00> : vector<8x512xf32>
    %131 = tpu.matmul %130, %128, %cst_81 {dimension_numbers = #tpu.dot_dimension_numbers<[1], [0], [0], [1], [0, 0, 1, 1], [], []>} : vector<8x4xbf16>, vector<4x512xbf16>, vector<8x512xf32> -> vector<8x512xf32>
    %132 = arith.addf %122, %131 : vector<8x512xf32>
    %133 = vector.extract_strided_slice %1 {offsets = [0, 17], sizes = [4, 495], strides = [1, 1]} : vector<4x512xbf16> to vector<4x495xbf16>
    %134 = vector.extract_strided_slice %1 {offsets = [0, 0], sizes = [4, 17], strides = [1, 1]} : vector<4x512xbf16> to vector<4x17xbf16>
    %135 = tpu.concatenate %133, %134 in 1 : vector<4x495xbf16>, vector<4x17xbf16> -> vector<4x512xbf16>
    %c8_82 = arith.constant 8 : index
    %c0_83 = arith.constant 0 : index
    %136 = vector.load %arg4[%c8_82, %c0_83] : memref<9x512xbf16, #tpu.memory_space<vmem>>, vector<1x512xbf16>
    %137 = vector.broadcast %136 : vector<1x512xbf16> to vector<4x512xbf16>
    %138 = arith.mulf %135, %137 : vector<4x512xbf16>
    %c15 = arith.constant 15 : index
    %c0_84 = arith.constant 0 : index
    %c0_85 = arith.constant 0 : index
    %139 = vector.load %arg2[%c15, %c0_84, %c0_85] : memref<16x8x4xbf16, #tpu.memory_space<vmem>>, vector<1x8x4xbf16>
    %140 = vector.shape_cast %139 : vector<1x8x4xbf16> to vector<8x4xbf16>
    %cst_86 = arith.constant dense<0.000000e+00> : vector<8x512xf32>
    %141 = tpu.matmul %140, %138, %cst_86 {dimension_numbers = #tpu.dot_dimension_numbers<[1], [0], [0], [1], [0, 0, 1, 1], [], []>} : vector<8x4xbf16>, vector<4x512xbf16>, vector<8x512xf32> -> vector<8x512xf32>
    %142 = arith.addf %132, %141 : vector<8x512xf32>
    %c0_87 = arith.constant 0 : index
    %c0_88 = arith.constant 0 : index
    %143 = vector.load %arg3[%c0_87, %c0_88] : memref<8x1xf32, #tpu.memory_space<vmem>>, vector<8x1xf32>
    %144 = vector.broadcast %143 : vector<8x1xf32> to vector<8x512xf32>
    %145 = arith.addf %142, %144 : vector<8x512xf32>
    %cst_89 = arith.constant 0.000000e+00 : f32
    %146 = vector.broadcast %cst_89 : f32 to vector<8x512xf32>
    %147 = arith.maximumf %145, %146 : vector<8x512xf32>
    %148 = arith.truncf %147 : vector<8x512xf32> to vector<8x512xbf16>
    %c0_90 = arith.constant 0 : index
    %c0_91 = arith.constant 0 : index
    %c0_92 = arith.constant 0 : index
    %149 = vector.load %arg5[%c0_90, %c0_91, %c0_92] : memref<1x8x512xbf16, #tpu.memory_space<vmem>>, vector<1x8x512xbf16>
    %150 = vector.shape_cast %149 : vector<1x8x512xbf16> to vector<8x512xbf16>
    %151 = vector.shape_cast %148 : vector<8x512xbf16> to vector<1x8x512xbf16>
    tpu.vector_store %arg5[%c0_90, %c0_91, %c0_92], %151 {strides = array<i32>} : memref<1x8x512xbf16, #tpu.memory_space<vmem>>, vector<1x8x512xbf16>,
    return
  }
  func.func @transform_0(%arg0: i32) -> (i32, i32, i32, i32) {
    %c0_i32 = arith.constant 0 : i32
    %c0_i32_0 = arith.constant 0 : i32
    %c0_i32_1 = arith.constant 0 : i32
    %c0_i32_2 = arith.constant 0 : i32
    return %arg0, %c0_i32, %c0_i32_0, %c0_i32_1 : i32, i32, i32, i32
  }
  func.func @transform_1(%arg0: i32) -> (i32, i32, i32) {
    %c0_i32 = arith.constant 0 : i32
    %c0_i32_0 = arith.constant 0 : i32
    %c0_i32_1 = arith.constant 0 : i32
    %c0_i32_2 = arith.constant 0 : i32
    return %c0_i32, %c0_i32_0, %c0_i32_1 : i32, i32, i32
  }
  func.func @transform_2(%arg0: i32) -> (i32, i32) {
    %c0_i32 = arith.constant 0 : i32
    %c0_i32_0 = arith.constant 0 : i32
    %c0_i32_1 = arith.constant 0 : i32
    return %c0_i32, %c0_i32_0 : i32, i32
  }
  func.func @transform_3(%arg0: i32) -> (i32, i32) {
    %c0_i32 = arith.constant 0 : i32
    %c0_i32_0 = arith.constant 0 : i32
    %c0_i32_1 = arith.constant 0 : i32
    return %c0_i32, %c0_i32_0 : i32, i32
  }
  func.func @transform_4(%arg0: i32) -> (i32, i32, i32) {
    %c0_i32 = arith.constant 0 : i32
    %c0_i32_0 = arith.constant 0 : i32
    %c0_i32_1 = arith.constant 0 : i32
    return %arg0, %c0_i32, %c0_i32_0 : i32, i32, i32
  }
}

</mosaic_0001>

<bundles_post_ra>
// kernel: tpu_custom_call.1
= control target key start
LH: loop header
LB: loop body
LE: loop exit
PB: predicated region body
PF: predicated region fallthrough
CT: control target
= control target key end

     0   :  { %s2715_s0 = inlined_call_operand.vmem [shape: bf16[1,4,4,512], index: 0, kind: input, shape index: {}]   ;;  %s2716_s1 = inlined_call_operand.vmem [shape: bf16[16,8,4], index: 1, kind: input, shape index: {}]   ;;  %s2717_s2 = inlined_call_operand.vmem [shape: f32[8,1], index: 2, kind: input, shape index: {}]   ;;  %s2718_s3 = inlined_call_operand.vmem [shape: bf16[9,512], index: 3, kind: input, shape index: {}]   ;;  %s2719_s4 = inlined_call_operand.hbm [shape: bf16[1,8,512], index: 4, kind: output, shape index: {}]  }
   0x1   :  { %v2202_v0 = vld [vmem:[%s2715_s0 + $0x18] sm:$0xff] }
   0x2   :  { %9 = vsyncpa [#allocation3], 0  ;;  %27 = vst [vmem:[#allocation1] ss:$4 sm:$0xff] %v2202_v0  ;;  %v2209_v2 = vld [vmem:[%s2715_s0 + $0x10] sm:$0xff]  ;;  %s2164_s19 = smov 16  }
   0x3   :  { %s2165_s20 = smov 17   ;;  %v2229_v18 = vld [vmem:[%s2715_s0 + $0x8] sm:$0xff]  ;;  %s2166_s23 = smov 15   ;;  %v2237_v24 = vld [vmem:[%s2715_s0] sm:$0xff]  ;;  %vm129_vm0 = vcmask 130048   ;;  %vm195_vm1 = vcmask 1041408  }
   0x4   :  { %s2167_s26 = smov 1   ;;  %s2168_s0 = smov 127   ;;  %v141_v42 = vld [vmem:[%s2718_s3] sm:$0x11]  ;;  %v142_v46 = vld [vmem:[%s2718_s3 + $0x8] sm:$0x11] }
   0x5   :  { %v146_v43 = vunpack.c.h.b16 %v141_v42  ;;  %v145_v49 = vunpack.c.l.b16 %v141_v42  ;;  %v147_v50 = vunpack.c.l.b16 %v142_v46  ;;  %v148_v53 = vunpack.c.h.b16 %v142_v46  ;;  %v2048_v46 = vld [vmem:[%s2716_s1 + $0x4] sm:$0xf]  ;;  %s2169_s21 = smov 113   ;;  %s2171_s8 = smov 111  }
   0x6   :  { %vm191_vm2 = vcmask 31744   ;;  %vm49_vm3 = vcmask 138240   ;;  %vm466_vm4 = vcmask 121856   ;;  %vm618_vm5 = vcmask 7168   ;;  %s2036_s17 = sshll.u32 %s2719_s4, 4  ;;  %s2037_s17 = int_to_ptr.hbm [resolvable:$true] %s2036_s17 }
   0x7   :  { %v150_v45 = vpack.c.b16 %v146_v43, %v146_v43  ;;  %v149_v54 = vpack.c.b16 %v145_v49, %v145_v49  ;;  %v151_v55 = vpack.c.b16 %v147_v50, %v147_v50  ;;  %v152_v57 = vpack.c.b16 %v148_v53, %v148_v53 }
   0x8   :  { %vm917_vm6 = vcmask 1039360   ;;  %vm1454_vm7 = vcmask 924672   ;;  %vm1605_vm8 = vcmask 916480   ;;  %vm1877_vm9 = vcmask 908288  }
   0x9   :  { %v28_v1 = vld.sshfl [vmem:[#allocation1 + $0x18] sm:$0xff pattern:$0x73625140]  ;;  %v159_v48 = vshrl.u32 %v150_v45, 16  ;;  %v154_v60 = vshrl.u32 %v149_v54, 16  ;;  %v164_v61 = vshrl.u32 %v151_v55, 16 }
   0xa   :  { %32 = vst [vmem:[#allocation1] ss:$4 sm:$0xff] %v2202_v0  ;;  %v169_v63 = vshrl.u32 %v152_v57, 16 }
   0xb   :  { %v160_v56 = vpack.i.b16 %v159_v48, %v159_v48 }
   0xd   :  { %v162_v62 = vperm.slane %v160_v56, 0 }
  0x11   :  { %v33_v3 = vld.sshfl [vmem:[#allocation1] sm:$0xff pattern:$0x73625140]  ;;  %v35_v4 = vld.sshfl [vmem:[#allocation1 + $0x8] sm:$0xff pattern:$0x73625140] }
  0x12   :  { %v37_v5 = vld.sshfl [vmem:[#allocation1 + $0x10] sm:$0xff pattern:$0x73625140]  ;;  %v39_v6 = vld.sshfl [vmem:[#allocation1 + $0x18] sm:$0xff pattern:$0x73625140] }
  0x13   :  { %107 = vst [vmem:[#allocation1] ss:$4 sm:$0xff] %v2209_v2 }
  0x1a   :  { %v108_v7 = vld.sshfl [vmem:[#allocation1 + $0x18] sm:$0xff pattern:$0x73625140] }
  0x1b   :  { %112 = vst [vmem:[#allocation1] ss:$4 sm:$0xff] %v2209_v2 }
  0x22   :  { %v119_v8 = vld.sshfl [vmem:[#allocation1 + $0x18] sm:$0xff pattern:$0x73625140]  ;;  %v115_v9 = vld.sshfl [vmem:[#allocation1 + $0x8] sm:$0xff pattern:$0x73625140] }
  0x23   :  { %127 = vrot.lane.b32.xlu1 %v119_v8, %s2164_s19  ;;  %123 = vrot.lane.b32.xlu0 %v115_v9, %s2164_s19  ;;  %v117_v10 = vld.sshfl [vmem:[#allocation1 + $0x10] sm:$0xff pattern:$0x73625140]  ;;  %v113_v11 = vld.sshfl [vmem:[#allocation1] sm:$0xff pattern:$0x73625140]  ;;  %v2286_v9 = vunpack.c.l.bf16 %v162_v62 }
  0x24   :  { %121 = vrot.lane.b32.xlu2 %v113_v11, %s2164_s19  ;;  %327 = vst [vmem:[#allocation1] ss:$4 sm:$0xff] %v2202_v0 }
  0x2b   :  { %110 = vrot.lane.b32.xlu1 %v108_v7, %s2164_s19  ;;  %125 = vrot.lane.b32.xlu0 %v117_v10, %s2164_s19  ;;  %v328_v12 = vld.sshfl [vmem:[#allocation1 + $0x18] sm:$0xff pattern:$0x73625140]  ;;  %v170_v10 = vpack.i.b16 %v169_v63, %v169_v63 }
  0x2c   :  { %332 = vst [vmem:[#allocation1] ss:$4 sm:$0xff] %v2202_v0  ;;  %43 = vrot.lane.b32.xlu2 %v35_v4, %s2165_s20  ;;  %v165_v4 = vpack.i.b16 %v164_v61, %v164_v61 }
  0x33   :  { %47 = vrot.lane.b32.xlu1 %v39_v6, %s2165_s20  ;;  %45 = vrot.lane.b32.xlu0 %v37_v5, %s2165_s20  ;;  %v335_v13 = vld.sshfl [vmem:[#allocation1 + $0x8] sm:$0xff pattern:$0x73625140]  ;;  %v337_v14 = vld.sshfl [vmem:[#allocation1 + $0x10] sm:$0xff pattern:$0x73625140] }
  0x34   :  { %v333_v15 = vld.sshfl [vmem:[#allocation1] sm:$0xff pattern:$0x73625140]  ;;  %v339_v16 = vld.sshfl [vmem:[#allocation1 + $0x18] sm:$0xff pattern:$0x73625140]  ;;  %30 = vrot.lane.b32.xlu2 %v28_v1, %s2165_s20 }
  0x35   :  { %444 = vst [vmem:[#allocation1] ss:$4 sm:$0xff] %v2209_v2  ;;  %v62_v1 = vld [vmem:[%s2718_s3 + $0x8] sm:$0x11] }
  0x36   :  { %v67_v5 = vunpack.c.l.b16 %v62_v1  ;;  %v68_v6 = vunpack.c.h.b16 %v62_v1 }
  0x3b   :  { %41 = vrot.lane.b32.xlu0 %v33_v3, %s2165_s20  ;;  %343 = vrot.lane.b32.xlu1 %v335_v13, %s2164_s19  ;;  %v155_v3 = vpack.i.b16 %v154_v60, %v154_v60 }
  0x3c   :  { %v445_v17 = vld.sshfl [vmem:[#allocation1 + $0x18] sm:$0xff pattern:$0x73625140]  ;;  %345 = vrot.lane.b32.xlu2 %v337_v14, %s2164_s19 }
  0x3d   :  { %449 = vst [vmem:[#allocation1] ss:$4 sm:$0xff] %v2209_v2  ;;  %v157_v14 = vperm.slane %v155_v3, 0 }
  0x43   :  { %347 = vrot.lane.b32.xlu0 %v339_v16, %s2164_s19  ;;  %330 = vrot.lane.b32.xlu1 %v328_v12, %s2164_s19  ;;  %v71_v16 = vpack.c.b16 %v67_v5, %v67_v5 }
  0x44   :  { %v454_v19 = vld.sshfl [vmem:[#allocation1 + $0x10] sm:$0xff pattern:$0x73625140]  ;;  %v456_v20 = vld.sshfl [vmem:[#allocation1 + $0x18] sm:$0xff pattern:$0x73625140]  ;;  %341 = vrot.lane.b32.xlu2 %v333_v15, %s2164_s19 }
  0x45   :  { %v452_v21 = vld.sshfl [vmem:[#allocation1 + $0x8] sm:$0xff pattern:$0x73625140]  ;;  %v450_v22 = vld.sshfl [vmem:[#allocation1] sm:$0xff pattern:$0x73625140] }
  0x46   :  { %596 = vst [vmem:[#allocation1] ss:$4 sm:$0xff] %v2229_v18  ;;  %v167_v15 = vperm.slane %v165_v4, 0 }
  0x4b   :  { %462 = vrot.lane.b32.xlu1 %v454_v19, %s2166_s23  ;;  %460 = vrot.lane.b32.xlu0 %v452_v21, %s2166_s23  ;;  %v61_v21 = vld [vmem:[%s2718_s3] sm:$0x11] }
  0x4c   :  { %464 = vrot.lane.b32.xlu2 %v456_v20, %s2166_s23  ;;  %v172_v20 = vperm.slane %v170_v10, 0 }
  0x4d   :  { %v597_v23 = vld.sshfl [vmem:[#allocation1 + $0x18] sm:$0xff pattern:$0x73625140] }
  0x4e   :  { %601 = vst [vmem:[#allocation1] ss:$4 sm:$0xff] %v2229_v18  ;;  %v2302_v42 = vunpack.c.l.bf16 %v172_v20 }
  0x53   :  { %447 = vrot.lane.b32.xlu0 %v445_v17, %s2166_s23  ;;  %458 = vrot.lane.b32.xlu1 %v450_v22, %s2166_s23  ;;  %v72_v17 = vpack.c.b16 %v68_v6, %v68_v6 }
  0x55   :  { %v606_v25 = vld.sshfl [vmem:[#allocation1 + $0x10] sm:$0xff pattern:$0x73625140]  ;;  %v608_v26 = vld.sshfl [vmem:[#allocation1 + $0x18] sm:$0xff pattern:$0x73625140] }
  0x56   :  { %v602_v27 = vld.sshfl [vmem:[#allocation1] sm:$0xff pattern:$0x73625140]  ;;  %v604_v28 = vld.sshfl [vmem:[#allocation1 + $0x8] sm:$0xff pattern:$0x73625140] }
  0x57   :  { %612 = vrot.lane.b32.xlu2 %v604_v28, %s2167_s26  ;;  %754 = vst [vmem:[#allocation1] ss:$4 sm:$0xff] %v2237_v24  ;;  %v66_v28 = vunpack.c.h.b16 %v61_v21 }
  0x59   :  { %v70_v54 = vpack.c.b16 %v66_v28, %v66_v28 }
  0x5b   :  { %614 = vrot.lane.b32.xlu0 %v606_v25, %s2167_s26  ;;  %616 = vrot.lane.b32.xlu1 %v608_v26, %s2167_s26  ;;  %v82_v25 = vpack.i.b16 %v71_v16, %v71_v16  ;;  %v86_v26 = vpack.i.b16 %v72_v17, %v72_v17  ;;  %v78_v6 = vpack.i.b16 %v70_v54, %v70_v54 }
  0x5e   :  { %v2243_v29 = vld.sshfl [vmem:[#allocation1] sm:$0xff pattern:$0x73625140]  ;;  %v2245_v30 = vld.sshfl [vmem:[#allocation1 + $0x8] sm:$0xff pattern:$0x73625140] }
  0x5f   :  { %v2247_v31 = vld.sshfl [vmem:[#allocation1 + $0x10] sm:$0xff pattern:$0x73625140]  ;;  %v2249_v32 = vld.sshfl [vmem:[#allocation1 + $0x18] sm:$0xff pattern:$0x73625140]  ;;  %599 = vrot.lane.b32.xlu2 %v597_v23, %s2167_s26 }
  0x60   :  { %828 = vst [vmem:[#allocation1] ss:$4 sm:$0xff] %v2229_v18 }
  0x63   :  { %610 = vrot.lane.b32.xlu0 %v602_v27, %s2167_s26  ;;  %v65_v27 = vunpack.c.l.b16 %v61_v21 }
  0x65   :  { %v69_v53 = vpack.c.b16 %v65_v27, %v65_v27 }
  0x67   :  { %v2254_v33 = vld.sshfl [vmem:[#allocation1] sm:$0xff pattern:$0x73625140]  ;;  %v2256_v34 = vld.sshfl [vmem:[#allocation1 + $0x8] sm:$0xff pattern:$0x73625140]  ;;  %v74_v5 = vpack.i.b16 %v69_v53, %v69_v53 }
  0x68   :  { %v2258_v35 = vld.sshfl [vmem:[#allocation1 + $0x10] sm:$0xff pattern:$0x73625140]  ;;  %v2260_v36 = vld.sshfl [vmem:[#allocation1 + $0x18] sm:$0xff pattern:$0x73625140] }
  0x69   :  { %900 = vst [vmem:[#allocation1] ss:$4 sm:$0xff] %v2237_v24 }
  0x70   :  { %v905_v37 = vld.sshfl [vmem:[#allocation1 + $0x10] sm:$0xff pattern:$0x73625140]  ;;  %v907_v38 = vld.sshfl [vmem:[#allocation1 + $0x18] sm:$0xff pattern:$0x73625140] }
  0x71   :  { %913 = vrot.lane.b32.xlu1 %v905_v37, %s2168_s0  ;;  %v903_v39 = vld.sshfl [vmem:[#allocation1 + $0x8] sm:$0xff pattern:$0x73625140]  ;;  %v901_v40 = vld.sshfl [vmem:[#allocation1] sm:$0xff pattern:$0x73625140]  ;;  %915 = vrot.lane.b32.xlu2 %v907_v38, %s2168_s0 }
  0x72   :  { %924 = vst [vmem:[#allocation1] ss:$4 sm:$0xff] %v2237_v24 }
  0x79   :  { %909 = vrot.lane.b32.xlu1 %v901_v40, %s2168_s0  ;;  %v925_v41 = vld.sshfl [vmem:[#allocation1] sm:$0xff pattern:$0x73625140]  ;;  %911 = vrot.lane.b32.xlu2 %v903_v39, %s2168_s0  ;;  %v2298_v40 = vunpack.c.l.bf16 %v157_v14 }
  0x7a   :  { %927 = vrot.lane.b32.xlu0 %v925_v41, %s2168_s0  ;;  %1055 = vst [vmem:[#allocation1] ss:$4 sm:$0xff] %v2202_v0  ;;  %v2300_v41 = vunpack.c.l.bf16 %v167_v15 }
  0x7e   :  { %v122_v47 = vpop.permute.xlu2 %121 }
  0x81   :  { %v1056_v44 = vld.sshfl [vmem:[#allocation1 + $0x18] sm:$0xff pattern:$0x73625140] }
  0x82   :  { %1060 = vst [vmem:[#allocation1] ss:$4 sm:$0xff] %v2202_v0 }
  0x86   :  { %v2279_v58 = vpop.permute.xlu2 %43 }
  0x89   :  { %v1065_v51 = vld.sshfl [vmem:[#allocation1 + $0x10] sm:$0xff pattern:$0x73625140]  ;;  %v1063_v52 = vld.sshfl [vmem:[#allocation1 + $0x8] sm:$0xff pattern:$0x73625140] }
  0x8a   :  { %1073 = vrot.lane.b32.xlu1 %v1065_v51, %s2167_s26  ;;  %1071 = vrot.lane.b32.xlu0 %v1063_v52, %s2167_s26  ;;  %v1061_v59 = vld.sshfl [vmem:[#allocation1] sm:$0xff pattern:$0x73625140]  ;;  %v1067_v22 = vld.sshfl [vmem:[#allocation1 + $0x18] sm:$0xff pattern:$0x73625140] }
  0x8b   :  { %1075 = vrot.lane.b32.xlu2 %v1067_v22, %s2167_s26  ;;  %1174 = vst [vmem:[#allocation1] ss:$4 sm:$0xff] %v2209_v2  ;;  %v84_v51 = vperm.slane %v82_v25, 0  ;;  %v88_v52 = vperm.slane %v86_v26, 0  ;;  %v80_v22 = vperm.slane %v78_v6, 0 }
  0x8d   :  { %v95_v4 = vunpack.c.l.bf16 %v84_v51  ;;  %v96_v14 = vunpack.c.l.bf16 %v88_v52 }
  0x8e   :  { %v2289_v13 = vpop.permute.xlu2 %30 }
  0x92   :  { %1069 = vrot.lane.b32.xlu1 %v1061_v59, %s2167_s26  ;;  %1058 = vrot.lane.b32.xlu0 %v1056_v44, %s2167_s26  ;;  %v2314_v57 = vld.sshfl [vmem:[#allocation1] sm:$0xff pattern:$0x73625140]  ;;  %v2316_v59 = vld.sshfl [vmem:[#allocation1 + $0x8] sm:$0xff pattern:$0x73625140] }
  0x93   :  { %v2320_v61 = vld.sshfl [vmem:[#allocation1 + $0x10] sm:$0xff pattern:$0x73625140]  ;;  %v2322_v62 = vld.sshfl [vmem:[#allocation1 + $0x18] sm:$0xff pattern:$0x73625140] }
  0x94   :  { %1248 = vst [vmem:[#allocation1] ss:$4 sm:$0xff] %v2202_v0  ;;  %s2170_s26 = smov 112  }
  0x95   :  { %v128_v7 = vpop.permute.xlu1 %127  ;;  %v124_v8 = vpop.permute.xlu0 %123 }
  0x96   :  { %v130_v11 = vsel %vm129_vm0, %v122_v47, %v124_v8  ;;  %v2318_v60 = vpop.permute.xlu2 %345 }
  0x97   :  { %v174_v12 = vunpack.c.l.bf16 %v130_v11 }
  0x99   :  { %v182_v19 = vmul.f32 %v2286_v9, %v174_v12 }
  0x9b   :  { %v186_v23 = vpack.c.bf16 %v182_v19, %v182_v19  ;;  %v76_v19 = vperm.slane %v74_v5, 0  ;;  %v2337_v25 = vld.sshfl [vmem:[#allocation1] sm:$0xff pattern:$0x73625140] }
  0x9c   :  { %v2339_v26 = vld.sshfl [vmem:[#allocation1 + $0x8] sm:$0xff pattern:$0x73625140] }
  0x9d   :  { %v111_v37 = vpop.permute.xlu1 %110  ;;  %v126_v38 = vpop.permute.xlu0 %125  ;;  %v200_v39 = vsel %vm195_vm1, %v186_v23, 0  ;;  %v479_v23 = vld [vmem:[%s2718_s3 + $0x8] sm:$0x22] }
  0x9e   :  { %v139_v43 = vsel %vm129_vm0, %v111_v37, %v122_v47  ;;  %v131_v44 = vsel %vm129_vm0, %v124_v8, %v126_v38  ;;  %v132_v45 = vsel %vm129_vm0, %v126_v38, %v128_v7  ;;  %228 = vmatpush.bf16.msra.mxu1 %v200_v39  ;;  %v2341_v37 = vld.sshfl [vmem:[#allocation1 + $0x10] sm:$0xff pattern:$0x73625140]  ;;  %v2343_v38 = vld.sshfl [vmem:[#allocation1 + $0x18] sm:$0xff pattern:$0x73625140]  ;;  %v342_v39 = vpop.permute.xlu2 %341  ;;  %v485_v51 = vunpack.c.h.b16 %v479_v23 }
  0x9f   :  { %v173_v48 = vunpack.c.l.bf16 %v139_v43  ;;  %v175_v49 = vunpack.c.l.bf16 %v131_v44  ;;  %v176_v50 = vunpack.c.l.bf16 %v132_v45  ;;  %v93_v43 = vunpack.c.l.bf16 %v76_v19  ;;  %1320 = vst [vmem:[#allocation1] ss:$4 sm:$0xff] %v2209_v2 }
  0xa0   :  { %v484_v44 = vunpack.c.l.b16 %v479_v23 }
  0xa1   :  { %v181_v55 = vmul.f32 %v2298_v40, %v173_v48  ;;  %v183_v47 = vmul.f32 %v2300_v41, %v175_v49  ;;  %v184_v56 = vmul.f32 %v2302_v42, %v176_v50  ;;  %2050 = vmatmul.msk.bf16.vlgmr.msra.gmra.mxu1 %vm191_vm2, %v2048_v46  ;;  %v94_v50 = vunpack.c.l.bf16 %v80_v22 }
  0xa3   :  { %v185_v63 = vpack.c.bf16 %v181_v55, %v181_v55  ;;  %v187_v1 = vpack.c.bf16 %v183_v47, %v183_v47  ;;  %v188_v3 = vpack.c.bf16 %v184_v56, %v184_v56 }
  0xa5   :  { %v48_v7 = vpop.permute.xlu1 %47  ;;  %v46_v8 = vpop.permute.xlu0 %45  ;;  %v197_v10 = vsel %vm195_vm1, %v185_v63, 0  ;;  %v203_v11 = vsel %vm195_vm1, %v187_v1, 0  ;;  %v206_v12 = vsel %vm195_vm1, %v188_v3, 0  ;;  %v488_v3 = vpack.c.b16 %v484_v44, %v484_v44 }
  0xa6   :  { %v51_v15 = vsel %vm49_vm3, %v2279_v58, %v46_v8  ;;  %v52_v16 = vsel %vm49_vm3, %v46_v8, %v48_v7  ;;  %215 = vmatpush.bf16.msra.mxu0 %v197_v10  ;;  %241 = vmatpush.bf16.msra.mxu2 %v203_v11  ;;  %v1325_v19 = vld.sshfl [vmem:[#allocation1 + $0x10] sm:$0xff pattern:$0x73625140] }
  0xa7   :  { %v91_v0 = vunpack.c.l.bf16 %v51_v15  ;;  %v92_v17 = vunpack.c.l.bf16 %v52_v16  ;;  %254 = vmatpush.bf16.msra.mxu3 %v206_v12  ;;  %v1327_v12 = vld.sshfl [vmem:[#allocation1 + $0x18] sm:$0xff pattern:$0x73625140]  ;;  %v631_v15 = vld [vmem:[%s2718_s3 + $0x8] sm:$0x22]  ;;  %1333 = vrot.lane.b32.xlu2 %v1325_v19, %s2168_s0 }
  0xa8   :  { %1335 = vrot.lane.b32.xlu0 %v1327_v12, %s2168_s0 }
  0xa9   :  { %2049 = vmatmul.msk.bf16.vlgmr.msra.gmra.mxu0 %vm191_vm2, %v2048_v46  ;;  %2051 = vmatmul.msk.bf16.vlgmr.msra.gmra.mxu2 %vm191_vm2, %v2048_v46  ;;  %v99_v20 = vmul.f32 %v95_v4, %v91_v0  ;;  %v100_v21 = vmul.f32 %v96_v14, %v92_v17  ;;  %v1321_v14 = vld.sshfl [vmem:[#allocation1] sm:$0xff pattern:$0x73625140] }
  0xaa   :  { %2052 = vmatmul.msk.bf16.vlgmr.msra.gmra.mxu3 %vm191_vm2, %v2048_v46 }
  0xab   :  { %v103_v27 = vpack.c.bf16 %v99_v20, %v99_v20  ;;  %v104_v28 = vpack.c.bf16 %v100_v21, %v100_v21  ;;  %v1323_v20 = vld.sshfl [vmem:[#allocation1 + $0x8] sm:$0xff pattern:$0x73625140] }
  0xac   :  { %1343 = vst [vmem:[#allocation1] ss:$4 sm:$0xff] %v2209_v2 }
  0xad   :  { %v42_v45 = vpop.permute.xlu0 %41  ;;  %v344_v48 = vpop.permute.xlu1 %343  ;;  %v270_v49 = vsel %vm195_vm1, %v103_v27, 0  ;;  %v273_v46 = vsel %vm195_vm1, %v104_v28, 0 }
  0xae   :  { %v50_v52 = vsel %vm49_vm3, %v42_v45, %v2279_v58  ;;  %v59_v53 = vsel %vm49_vm3, %v2289_v13, %v42_v45  ;;  %v350_v54 = vsel %vm129_vm0, %v344_v48, %v2318_v60  ;;  %308 = vmatpush.bf16.msrb.mxu2 %v270_v49  ;;  %321 = vmatpush.bf16.msrb.mxu3 %v273_v46  ;;  %v478_v13 = vld [vmem:[%s2718_s3] sm:$0x22] }
  0xaf   :  { %v89_v55 = vunpack.c.l.bf16 %v59_v53  ;;  %v90_v47 = vunpack.c.l.bf16 %v50_v52  ;;  %v361_v56 = vunpack.c.l.bf16 %v350_v54  ;;  %v349_v63 = vsel %vm129_vm0, %v342_v39, %v344_v48  ;;  %v105_v45 = vld [vmem:[%s2716_s1] sm:$0xf]  ;;  %1329 = vrot.lane.b32.xlu2 %v1321_v14, %s2168_s0 }
  0xb0   :  { %v360_v1 = vunpack.c.l.bf16 %v349_v63  ;;  %v489_v58 = vpack.c.b16 %v485_v51, %v485_v51  ;;  %v482_v0 = vunpack.c.l.b16 %v478_v13  ;;  %v483_v17 = vunpack.c.h.b16 %v478_v13  ;;  %1331 = vrot.lane.b32.xlu0 %v1323_v20, %s2168_s0 }
  0xb1   :  { %v365_v4 = vmul.f32 %v361_v56, %v2300_v41  ;;  %v97_v5 = vmul.f32 %v93_v43, %v89_v55  ;;  %v98_v6 = vmul.f32 %v94_v50, %v90_v47  ;;  %v499_v41 = vpack.i.b16 %v488_v3, %v488_v3  ;;  %v465_v56 = vpop.permute.xlu2 %464 }
  0xb2   :  { %v364_v7 = vmul.f32 %v360_v1, %v2286_v9  ;;  %v503_v28 = vpack.i.b16 %v489_v58, %v489_v58  ;;  %v486_v50 = vpack.c.b16 %v482_v0, %v482_v0  ;;  %v487_v51 = vpack.c.b16 %v483_v17, %v483_v17 }
  0xb3   :  { %v369_v8 = vpack.c.bf16 %v365_v4, %v365_v4  ;;  %v101_v10 = vpack.c.bf16 %v97_v5, %v97_v5  ;;  %v102_v11 = vpack.c.bf16 %v98_v6, %v98_v6  ;;  %v501_v2 = vperm.slane %v499_v41, 1 }
  0xb4   :  { %v368_v16 = vpack.c.bf16 %v364_v7, %v364_v7  ;;  %v637_v52 = vunpack.c.h.b16 %v631_v15  ;;  %v505_v53 = vperm.slane %v503_v28, 1  ;;  %v636_v54 = vunpack.c.l.b16 %v631_v15 }
  0xb5   :  { %v348_v21 = vpop.permute.xlu0 %347  ;;  %v331_v22 = vpop.permute.xlu1 %330  ;;  %v264_v9 = vsel %vm195_vm1, %v101_v10, 0  ;;  %v267_v23 = vsel %vm195_vm1, %v102_v11, 0  ;;  %v383_v27 = vsel %vm195_vm1, %v369_v8, 0  ;;  %v512_v63 = vunpack.c.l.bf16 %v501_v2  ;;  %v630_v8 = vld [vmem:[%s2718_s3] sm:$0x22] }
  0xb6   :  { %v351_v43 = vsel %vm129_vm0, %v2318_v60, %v348_v21  ;;  %v357_v44 = vsel %vm129_vm0, %v331_v22, %v342_v39  ;;  %282 = vmatpush.bf16.msrb.mxu0 %v264_v9  ;;  %295 = vmatpush.bf16.msrb.mxu1 %v267_v23  ;;  %v380_v48 = vsel %vm195_vm1, %v368_v16, 0  ;;  %v491_v1 = vpack.i.b16 %v486_v50, %v486_v50 }
  0xb7   :  { %v362_v49 = vunpack.c.l.bf16 %v351_v43  ;;  %v359_v46 = vunpack.c.l.bf16 %v357_v44  ;;  %421 = vmatpush.bf16.msra.mxu2 %v383_v27  ;;  %v495_v3 = vpack.i.b16 %v487_v51, %v487_v51  ;;  %v513_v58 = vunpack.c.l.bf16 %v505_v53  ;;  %v2057_v53 = vld [vmem:[%s2716_s1 + $0x8] sm:$0xf] }
  0xb8   :  { %v640_v7 = vpack.c.b16 %v636_v54, %v636_v54  ;;  %v493_v16 = vperm.slane %v491_v1, 1  ;;  %v635_v17 = vunpack.c.h.b16 %v630_v8  ;;  %v634_v22 = vunpack.c.l.b16 %v630_v8 }
  0xb9   :  { %v366_v60 = vmul.f32 %v362_v49, %v2302_v42  ;;  %v363_v39 = vmul.f32 %v359_v46, %v2298_v40  ;;  %2053 = vmatmul.msk.bf16.vlgmr.msrb.gmra.mxu0 %vm191_vm2, %v105_v45  ;;  %2054 = vmatmul.msk.bf16.vlgmr.msrb.gmra.mxu1 %vm191_vm2, %v105_v45  ;;  %v1344_v40 = vld.sshfl [vmem:[#allocation1] sm:$0xff pattern:$0x73625140]  ;;  %v641_v42 = vpack.c.b16 %v637_v52, %v637_v52  ;;  %v497_v41 = vperm.slane %v495_v3, 1 }
  0xba   :  { %408 = vmatpush.bf16.msra.mxu1 %v380_v48  ;;  %2055 = vmatmul.msk.bf16.vlgmr.msrb.gmra.mxu2 %vm191_vm2, %v105_v45  ;;  %1437 = vst [vmem:[#allocation1] ss:$4 sm:$0xff] %v2229_v18  ;;  %v653_v21 = vshrl.u32 %v640_v7, 16  ;;  %v510_v27 = vunpack.c.l.bf16 %v493_v16  ;;  %v639_v43 = vpack.c.b16 %v635_v17, %v635_v17  ;;  %v638_v52 = vpack.c.b16 %v634_v22, %v634_v22 }
  0xbb   :  { %2056 = vmatmul.msk.bf16.vlgmr.msrb.gmra.mxu3 %vm191_vm2, %v105_v45  ;;  %v370_v55 = vpack.c.bf16 %v366_v60, %v366_v60  ;;  %v367_v47 = vpack.c.bf16 %v363_v39, %v363_v39  ;;  %1346 = vrot.lane.b32.xlu1 %v1344_v40, %s2168_s0  ;;  %v658_v0 = vshrl.u32 %v641_v42, 16  ;;  %v511_v14 = vunpack.c.l.bf16 %v497_v41  ;;  %v613_v42 = vpop.permute.xlu2 %612 }
  0xbc   :  { %v654_v50 = vpack.i.b16 %v653_v21, %v653_v21 }
  0xbd   :  { %v463_v4 = vpop.permute.xlu1 %462  ;;  %v461_v5 = vpop.permute.xlu0 %460  ;;  %v386_v6 = vsel %vm195_vm1, %v370_v55, 0  ;;  %v377_v13 = vsel %vm195_vm1, %v367_v47, 0  ;;  %v659_v28 = vpack.i.b16 %v658_v0, %v658_v0 }
  0xbe   :  { %v468_v10 = vsel %vm466_vm4, %v461_v5, %v463_v4  ;;  %434 = vmatpush.bf16.msra.mxu3 %v386_v6  ;;  %v469_v11 = vsel %vm466_vm4, %v463_v4, %v465_v56  ;;  %395 = vmatpush.bf16.msra.mxu0 %v377_v13  ;;  %v656_v40 = vperm.slane %v654_v50, 1  ;;  %v643_v4 = vshrl.u32 %v638_v52, 16 }
  0xbf   :  { %v508_v12 = vunpack.c.l.bf16 %v468_v10  ;;  %v509_v15 = vunpack.c.l.bf16 %v469_v11  ;;  %v661_v56 = vperm.slane %v659_v28, 1 }
  0xc0   :  { %v2410_v11 = vunpack.c.l.bf16 %v656_v40  ;;  %v934_v40 = vld [vmem:[%s2718_s3] sm:$0x44] }
  0xc1   :  { %v516_v19 = vmul.f32 %v512_v63, %v508_v12  ;;  %v517_v20 = vmul.f32 %v513_v58, %v509_v15  ;;  %v1442_v44 = vld.sshfl [vmem:[#allocation1 + $0x10] sm:$0xff pattern:$0x73625140]  ;;  %v1444_v45 = vld.sshfl [vmem:[#allocation1 + $0x18] sm:$0xff pattern:$0x73625140]  ;;  %v2407_v58 = vunpack.c.l.bf16 %v661_v56  ;;  %v644_v15 = vpack.i.b16 %v643_v4, %v643_v4 }
  0xc2   :  { %v1440_v51 = vld.sshfl [vmem:[#allocation1 + $0x8] sm:$0xff pattern:$0x73625140]  ;;  %1452 = vrot.lane.b32.xlu2 %v1444_v45, %s2169_s21  ;;  %v1438_v54 = vld.sshfl [vmem:[#allocation1] sm:$0xff pattern:$0x73625140] }
  0xc3   :  { %v520_v9 = vpack.c.bf16 %v516_v19, %v516_v19  ;;  %v521_v23 = vpack.c.bf16 %v517_v20, %v517_v20  ;;  %1450 = vrot.lane.b32.xlu1 %v1442_v44, %s2169_s21  ;;  %1461 = vst [vmem:[#allocation1] ss:$4 sm:$0xff] %v2229_v18  ;;  %v648_v63 = vshrl.u32 %v639_v43, 16  ;;  %v2062_v44 = vld [vmem:[%s2716_s1 + $0xc] sm:$0xf]  ;;  %v762_v4 = vsel %vm195_vm1, %v2243_v29, 0 }
  0xc5   :  { %v448_v48 = vpop.permute.xlu0 %447  ;;  %v459_v49 = vpop.permute.xlu1 %458  ;;  %v534_v46 = vsel %vm195_vm1, %v520_v9, 0  ;;  %v537_v2 = vsel %vm195_vm1, %v521_v23, 0  ;;  %v649_v13 = vpack.i.b16 %v648_v63, %v648_v63  ;;  %v646_v9 = vperm.slane %v644_v15, 1 }
  0xc6   :  { %v467_v60 = vsel %vm466_vm4, %v459_v49, %v461_v5  ;;  %v476_v39 = vsel %vm466_vm4, %v448_v48, %v459_v49  ;;  %572 = vmatpush.bf16.msrb.mxu2 %v534_v46  ;;  %585 = vmatpush.bf16.msrb.mxu3 %v537_v2 }
  0xc7   :  { %v506_v55 = vunpack.c.l.bf16 %v476_v39  ;;  %v507_v47 = vunpack.c.l.bf16 %v467_v60  ;;  %v651_v22 = vperm.slane %v649_v13, 1  ;;  %v2426_v45 = vunpack.c.l.bf16 %v646_v9 }
  0xc8   :  { %v938_v13 = vunpack.c.l.b16 %v934_v40  ;;  %v840_v9 = vsel %vm195_vm1, %v2258_v35, 0 }
  0xc9   :  { %v514_v1 = vmul.f32 %v510_v27, %v506_v55  ;;  %v515_v3 = vmul.f32 %v511_v14, %v507_v47  ;;  %2058 = vmatmul.msk.bf16.vlgmr.msra.gmra.mxu0 %vm191_vm2, %v2057_v53  ;;  %2059 = vmatmul.msk.bf16.vlgmr.msra.gmra.mxu1 %vm191_vm2, %v2057_v53  ;;  %v600_v14 = vpop.permute.xlu2 %599  ;;  %v2421_v28 = vunpack.c.l.bf16 %v651_v22  ;;  %v768_v55 = vsel %vm195_vm1, %v2249_v32, 0 }
  0xca   :  { %2060 = vmatmul.msk.bf16.vlgmr.msra.gmra.mxu2 %vm191_vm2, %v2057_v53  ;;  %1448 = vrot.lane.b32.xlu2 %v1440_v51, %s2169_s21  ;;  %v1462_v0 = vld.sshfl [vmem:[#allocation1] sm:$0xff pattern:$0x73625140] }
  0xcb   :  { %2061 = vmatmul.msk.bf16.vlgmr.msra.gmra.mxu3 %vm191_vm2, %v2057_v53  ;;  %v518_v5 = vpack.c.bf16 %v514_v1, %v514_v1  ;;  %v519_v6 = vpack.c.bf16 %v515_v3, %v515_v3  ;;  %1446 = vrot.lane.b32.xlu1 %v1438_v54, %s2169_s21  ;;  %1588 = vst [vmem:[#allocation1] ss:$4 sm:$0xff] %v2237_v24  ;;  %v766_v54 = vsel %vm195_vm1, %v2247_v31, 0  ;;  %v935_v31 = vld [vmem:[%s2718_s3 + $0x8] sm:$0x44] }
  0xcc   :  { %1464 = vrot.lane.b32.xlu0 %v1462_v0, %s2169_s21  ;;  %v940_v3 = vunpack.c.l.b16 %v935_v31 }
  0xcd   :  { %v615_v7 = vpop.permute.xlu0 %614  ;;  %v531_v8 = vsel %vm195_vm1, %v519_v6, 0  ;;  %v617_v10 = vpop.permute.xlu1 %616  ;;  %v528_v12 = vsel %vm195_vm1, %v518_v5, 0  ;;  %v764_v5 = vsel %vm195_vm1, %v2245_v30, 0  ;;  %v939_v6 = vunpack.c.h.b16 %v934_v40 }
  0xce   :  { %559 = vmatpush.bf16.msrb.mxu1 %v531_v8  ;;  %v621_v16 = vsel %vm618_vm5, %v615_v7, %v617_v10  ;;  %v620_v41 = vsel %vm618_vm5, %v613_v42, %v615_v7  ;;  %546 = vmatpush.bf16.msrb.mxu0 %v528_v12  ;;  %v944_v10 = vpack.c.b16 %v940_v3, %v940_v3 }
  0xcf   :  { %v665_v17 = vunpack.c.l.bf16 %v621_v16  ;;  %v664_v19 = vunpack.c.l.bf16 %v620_v41  ;;  %v943_v15 = vpack.c.b16 %v939_v6, %v939_v6  ;;  %v942_v16 = vpack.c.b16 %v938_v13, %v938_v13 }
  0xd0   :  { %v957_v41 = vshrl.u32 %v944_v10, 16 }
  0xd1   :  { %v673_v20 = vmul.f32 %v2407_v58, %v665_v17  ;;  %v672_v21 = vmul.f32 %v2410_v11, %v664_v19  ;;  %v2448_v1 = vpop.permute.xlu2 %915  ;;  %v952_v30 = vshrl.u32 %v943_v15, 16 }
  0xd2   :  { %v1595_v50 = vld.sshfl [vmem:[#allocation1 + $0x18] sm:$0xff pattern:$0x73625140]  ;;  %v1593_v51 = vld.sshfl [vmem:[#allocation1 + $0x10] sm:$0xff pattern:$0x73625140]  ;;  %v958_v17 = vpack.i.b16 %v957_v41, %v957_v41 }
  0xd3   :  { %v677_v23 = vpack.c.bf16 %v673_v20, %v673_v20  ;;  %v676_v27 = vpack.c.bf16 %v672_v21, %v672_v21  ;;  %1603 = vrot.lane.b32.xlu1 %v1595_v50, %s2170_s26  ;;  %v1591_v39 = vld.sshfl [vmem:[#allocation1 + $0x8] sm:$0xff pattern:$0x73625140]  ;;  %v1589_v53 = vld.sshfl [vmem:[#allocation1] sm:$0xff pattern:$0x73625140]  ;;  %v953_v19 = vpack.i.b16 %v952_v30, %v952_v30 }
  0xd4   :  { %1601 = vrot.lane.b32.xlu0 %v1593_v51, %s2170_s26  ;;  %1612 = vst [vmem:[#allocation1] ss:$4 sm:$0xff] %v2237_v24  ;;  %v947_v20 = vshrl.u32 %v942_v16, 16 }
  0xd5   :  { %v611_v43 = vpop.permute.xlu0 %610  ;;  %v690_v48 = vsel %vm195_vm1, %v676_v27, 0  ;;  %v693_v49 = vsel %vm195_vm1, %v677_v23, 0  ;;  %v842_v23 = vsel %vm195_vm1, %v2260_v36, 0 }
  0xd6   :  { %v619_v46 = vsel %vm618_vm5, %v611_v43, %v613_v42  ;;  %v628_v2 = vsel %vm618_vm5, %v600_v14, %v611_v43  ;;  %728 = vmatpush.bf16.msra.mxu2 %v690_v48  ;;  %741 = vmatpush.bf16.msra.mxu3 %v693_v49  ;;  %v941_v42 = vunpack.c.h.b16 %v935_v31  ;;  %v2067_v14 = vld [vmem:[%s2716_s1 + $0x10] sm:$0xf]  ;;  %v960_v43 = vperm.slane %v958_v17, 2 }
  0xd7   :  { %v663_v52 = vunpack.c.l.bf16 %v619_v46  ;;  %v662_v60 = vunpack.c.l.bf16 %v628_v2  ;;  %v948_v48 = vpack.i.b16 %v947_v20, %v947_v20 }
  0xd8   :  { %v945_v12 = vpack.c.b16 %v941_v42, %v941_v42 }
  0xd9   :  { %v671_v47 = vmul.f32 %v2421_v28, %v663_v52  ;;  %2063 = vmatmul.msk.bf16.vlgmr.msrb.gmra.mxu0 %vm191_vm2, %v2062_v44  ;;  %2064 = vmatmul.msk.bf16.vlgmr.msrb.gmra.mxu1 %vm191_vm2, %v2062_v44  ;;  %v670_v56 = vmul.f32 %v2426_v45, %v662_v60  ;;  %v912_v27 = vpop.permute.xlu2 %911  ;;  %v836_v52 = vsel %vm195_vm1, %v2254_v33, 0  ;;  %v838_v60 = vsel %vm195_vm1, %v2256_v34, 0 }
  0xda   :  { %2065 = vmatmul.msk.bf16.vlgmr.msrb.gmra.mxu2 %vm191_vm2, %v2062_v44  ;;  %v962_v0 = vshrl.u32 %v945_v12, 16 }
  0xdb   :  { %2066 = vmatmul.msk.bf16.vlgmr.msrb.gmra.mxu3 %vm191_vm2, %v2062_v44  ;;  %v675_v63 = vpack.c.bf16 %v671_v47, %v671_v47  ;;  %v674_v32 = vpack.c.bf16 %v670_v56, %v670_v56  ;;  %803 = vmatpush.bf16.msrb.mxu2 %v766_v54  ;;  %v1613_v29 = vld.sshfl [vmem:[#allocation1] sm:$0xff pattern:$0x73625140]  ;;  %v955_v44 = vperm.slane %v953_v19, 2 }
  0xdc   :  { %816 = vmatpush.bf16.msrb.mxu3 %v768_v55  ;;  %1599 = vrot.lane.b32.xlu1 %v1591_v39, %s2170_s26  ;;  %1743 = vst [vmem:[#allocation1] ss:$4 sm:$0xff] %v2229_v18  ;;  %v963_v21 = vpack.i.b16 %v962_v0, %v962_v0  ;;  %v950_v39 = vperm.slane %v948_v48, 2 }
  0xdd   :  { %v687_v7 = vsel %vm195_vm1, %v675_v63, 0  ;;  %v684_v8 = vsel %vm195_vm1, %v674_v32, 0  ;;  %1597 = vrot.lane.b32.xlu0 %v1589_v53, %s2170_s26  ;;  %1615 = vrot.lane.b32.xlu2 %v1613_v29, %s2170_s26  ;;  %v2483_v53 = vunpack.c.l.bf16 %v960_v43  ;;  %v2485_v55 = vunpack.c.l.bf16 %v955_v44 }
  0xde   :  { %715 = vmatpush.bf16.msra.mxu1 %v687_v7  ;;  %702 = vmatpush.bf16.msra.mxu0 %v684_v8  ;;  %v965_v49 = vperm.slane %v963_v21, 2  ;;  %v2493_v63 = vunpack.c.l.bf16 %v950_v39  ;;  %v2072_v8 = vld [vmem:[%s2716_s1 + $0x14] sm:$0xf] }
  0xe0   :  { %v2488_v33 = vunpack.c.l.bf16 %v965_v49 }
  0xe2   :  { %777 = vmatpush.bf16.msrb.mxu0 %v762_v4  ;;  %790 = vmatpush.bf16.msrb.mxu1 %v764_v5 }
  0xe3   :  { %v914_v22 = vpop.permute.xlu1 %913  ;;  %v1750_v46 = vld.sshfl [vmem:[#allocation1 + $0x18] sm:$0xff pattern:$0x73625140]  ;;  %v1744_v2 = vld.sshfl [vmem:[#allocation1] sm:$0xff pattern:$0x73625140] }
  0xe4   :  { %v1748_v50 = vld.sshfl [vmem:[#allocation1 + $0x10] sm:$0xff pattern:$0x73625140]  ;;  %v920_v35 = vsel %vm917_vm6, %v914_v22, %v2448_v1  ;;  %v1746_v51 = vld.sshfl [vmem:[#allocation1 + $0x8] sm:$0xff pattern:$0x73625140]  ;;  %v919_v36 = vsel %vm917_vm6, %v912_v27, %v914_v22 }
  0xe5   :  { %1758 = vrot.lane.b32.xlu0 %v1750_v46, %s2170_s26  ;;  %1766 = vst [vmem:[#allocation1] ss:$4 sm:$0xff] %v2229_v18  ;;  %v968_v54 = vunpack.c.l.bf16 %v920_v35  ;;  %v967_v47 = vunpack.c.l.bf16 %v919_v36  ;;  %1756 = vrot.lane.b32.xlu2 %v1748_v50, %s2170_s26  ;;  %v1076_v17 = vpop.permute.xlu2 %1075  ;;  %v2077_v35 = vld [vmem:[%s2716_s1 + $0x18] sm:$0xf] }
  0xe7   :  { %v976_v40 = vmul.f32 %v2483_v53, %v968_v54  ;;  %v975_v42 = vmul.f32 %v2485_v55, %v967_v47  ;;  %v2082_v47 = vld [vmem:[%s2716_s1 + $0x1c] sm:$0xf] }
  0xe9   :  { %2068 = vmatmul.msk.bf16.vlgmr.msra.gmra.mxu0 %vm191_vm2, %v2067_v14  ;;  %2069 = vmatmul.msk.bf16.vlgmr.msra.gmra.mxu1 %vm191_vm2, %v2067_v14  ;;  %v980_v6 = vpack.c.bf16 %v976_v40, %v976_v40  ;;  %v979_v13 = vpack.c.bf16 %v975_v42, %v975_v42 }
  0xea   :  { %2070 = vmatmul.msk.bf16.vlgmr.msra.gmra.mxu2 %vm191_vm2, %v2067_v14  ;;  %851 = vmatpush.bf16.msra.mxu0 %v836_v52 }
  0xeb   :  { %2071 = vmatmul.msk.bf16.vlgmr.msra.gmra.mxu3 %vm191_vm2, %v2067_v14  ;;  %877 = vmatpush.bf16.msra.mxu2 %v840_v9  ;;  %v910_v18 = vpop.permute.xlu1 %909  ;;  %v991_v12 = vsel %vm195_vm1, %v979_v13, 0  ;;  %v994_v15 = vsel %vm195_vm1, %v980_v6, 0  ;;  %v1258_v6 = vsel %vm195_vm1, %v2339_v26, 0 }
  0xec   :  { %890 = vmatpush.bf16.msra.mxu3 %v842_v23  ;;  %v918_v56 = vsel %vm917_vm6, %v910_v18, %v912_v27  ;;  %v928_v31 = vpop.permute.xlu0 %927  ;;  %864 = vmatpush.bf16.msra.mxu1 %v838_v60  ;;  %v1767_v4 = vld.sshfl [vmem:[#allocation1] sm:$0xff pattern:$0x73625140]  ;;  %v1186_v18 = vsel %vm195_vm1, %v2320_v61, 0 }
  0xed   :  { %v932_v34 = vsel %vm917_vm6, %v2448_v1, %v928_v31  ;;  %v966_v32 = vunpack.c.l.bf16 %v918_v56  ;;  %1754 = vrot.lane.b32.xlu0 %v1746_v51, %s2170_s26  ;;  %1769 = vrot.lane.b32.xlu1 %v1767_v4, %s2170_s26  ;;  %1860 = vst [vmem:[#allocation1] ss:$4 sm:$0xff] %v2237_v24  ;;  %v1188_v56 = vsel %vm195_vm1, %v2322_v62, 0  ;;  %v1182_v31 = vsel %vm195_vm1, %v2314_v57, 0 }
  0xee   :  { %v969_v3 = vunpack.c.l.bf16 %v932_v34  ;;  %1752 = vrot.lane.b32.xlu2 %v1744_v2, %s2170_s26  ;;  %v1184_v34 = vsel %vm195_vm1, %v2316_v59, 0  ;;  %v1260_v4 = vsel %vm195_vm1, %v2341_v37, 0 }
  0xef   :  { %v974_v1 = vmul.f32 %v2493_v63, %v966_v32 }
  0xf0   :  { %v977_v5 = vmul.f32 %v2488_v33, %v969_v3  ;;  %v2087_v3 = vld [vmem:[%s2716_s1 + $0x20] sm:$0xf] }
  0xf1   :  { %v978_v10 = vpack.c.bf16 %v974_v1, %v974_v1  ;;  %v1256_v1 = vsel %vm195_vm1, %v2337_v25, 0  ;;  %v1472_v25 = vld [vmem:[%s2718_s3 + $0x8] sm:$0x88] }
  0xf2   :  { %v981_v7 = vpack.c.bf16 %v977_v5, %v977_v5  ;;  %v1262_v5 = vsel %vm195_vm1, %v2343_v38, 0 }
  0xf3   :  { %v988_v19 = vsel %vm195_vm1, %v978_v10, 0 }
  0xf4   :  { %v997_v16 = vsel %vm195_vm1, %v981_v7, 0  ;;  %v1861_v29 = vld.sshfl [vmem:[#allocation1] sm:$0xff pattern:$0x73625140] }
  0xf5   :  { %v1863_v41 = vld.sshfl [vmem:[#allocation1 + $0x8] sm:$0xff pattern:$0x73625140]  ;;  %v1867_v0 = vld.sshfl [vmem:[#allocation1 + $0x18] sm:$0xff pattern:$0x73625140] }
  0xf6   :  { %v1865_v30 = vld.sshfl [vmem:[#allocation1 + $0x10] sm:$0xff pattern:$0x73625140]  ;;  %1875 = vrot.lane.b32.xlu2 %v1867_v0, %s2171_s8 }
  0xf7   :  { %1884 = vst [vmem:[#allocation1] ss:$4 sm:$0xff] %v2237_v24  ;;  %1873 = vrot.lane.b32.xlu1 %v1865_v30, %s2171_s8 }
  0xf9   :  { %2073 = vmatmul.msk.bf16.vlgmr.msrb.gmra.mxu0 %vm191_vm2, %v2072_v8  ;;  %2074 = vmatmul.msk.bf16.vlgmr.msrb.gmra.mxu1 %vm191_vm2, %v2072_v8 }
  0xfa   :  { %2075 = vmatmul.msk.bf16.vlgmr.msrb.gmra.mxu2 %vm191_vm2, %v2072_v8  ;;  %1019 = vmatpush.bf16.msrb.mxu1 %v991_v12  ;;  %v1477_v12 = vunpack.c.l.b16 %v1472_v25 }
  0xfb   :  { %2076 = vmatmul.msk.bf16.vlgmr.msrb.gmra.mxu3 %vm191_vm2, %v2072_v8  ;;  %1032 = vmatpush.bf16.msrb.mxu2 %v994_v15 }
  0xfc   :  { %v1074_v20 = vpop.permute.xlu1 %1073  ;;  %1045 = vmatpush.bf16.msrb.mxu3 %v997_v16  ;;  %v1072_v21 = vpop.permute.xlu0 %1071  ;;  %1006 = vmatpush.bf16.msrb.mxu0 %v988_v19  ;;  %v1481_v19 = vpack.c.b16 %v1477_v12, %v1477_v12 }
  0xfd   :  { %v1079_v22 = vsel %vm618_vm5, %v1074_v20, %v1076_v17  ;;  %v1078_v9 = vsel %vm618_vm5, %v1072_v21, %v1074_v20 }
  0xfe   :  { %v1090_v23 = vunpack.c.l.bf16 %v1079_v22  ;;  %v1089_v27 = vunpack.c.l.bf16 %v1078_v9  ;;  %v1885_v43 = vld.sshfl [vmem:[#allocation1] sm:$0xff pattern:$0x73625140]  ;;  %1871 = vrot.lane.b32.xlu2 %v1863_v41, %s2171_s8  ;;  %v1492_v9 = vpack.i.b16 %v1481_v19, %v1481_v19 }
  0xff   :  { %1887 = vrot.lane.b32.xlu0 %v1885_v43, %s2171_s8  ;;  %1869 = vrot.lane.b32.xlu1 %v1861_v29, %s2171_s8 }
 0x100   :  { %v1094_v24 = vmul.f32 %v1090_v23, %v2407_v58  ;;  %v1093_v14 = vmul.f32 %v1089_v27, %v2410_v11 }
 0x101   :  { %v1334_v62 = vpop.permute.xlu2 %1333 }
 0x102   :  { %v1098_v44 = vpack.c.bf16 %v1094_v24, %v1094_v24  ;;  %v1097_v48 = vpack.c.bf16 %v1093_v14, %v1093_v14 }
 0x104   :  { %v1070_v49 = vpop.permute.xlu1 %1069  ;;  %v1059_v46 = vpop.permute.xlu0 %1058  ;;  %v1111_v52 = vsel %vm195_vm1, %v1097_v48, 0  ;;  %v1114_v60 = vsel %vm195_vm1, %v1098_v44, 0  ;;  %v1471_v44 = vld [vmem:[%s2718_s3] sm:$0x88] }
 0x105   :  { %v1077_v2 = vsel %vm618_vm5, %v1070_v49, %v1072_v21  ;;  %v1085_v50 = vsel %vm618_vm5, %v1059_v46, %v1070_v49  ;;  %v1476_v46 = vunpack.c.h.b16 %v1471_v44 }
 0x106   :  { %v1088_v51 = vunpack.c.l.bf16 %v1077_v2  ;;  %v1087_v58 = vunpack.c.l.bf16 %v1085_v50  ;;  %v1478_v2 = vunpack.c.h.b16 %v1472_v25 }
 0x108   :  { %v1092_v11 = vmul.f32 %v1088_v51, %v2421_v28  ;;  %v1091_v36 = vmul.f32 %v1087_v58, %v2426_v45 }
 0x109   :  { %2078 = vmatmul.msk.bf16.vlgmr.msra.gmra.mxu0 %vm191_vm2, %v2077_v35  ;;  %2079 = vmatmul.msk.bf16.vlgmr.msra.gmra.mxu1 %vm191_vm2, %v2077_v35  ;;  %v1330_v42 = vpop.permute.xlu2 %1329 }
 0x10a   :  { %2080 = vmatmul.msk.bf16.vlgmr.msra.gmra.mxu2 %vm191_vm2, %v2077_v35  ;;  %v1096_v39 = vpack.c.bf16 %v1092_v11, %v1092_v11  ;;  %v1095_v54 = vpack.c.bf16 %v1091_v36, %v1091_v36 }
 0x10b   :  { %2081 = vmatmul.msk.bf16.vlgmr.msra.gmra.mxu3 %vm191_vm2, %v2077_v35  ;;  %1149 = vmatpush.bf16.msra.mxu2 %v1111_v52  ;;  %v1480_v52 = vpack.c.b16 %v1476_v46, %v1476_v46 }
 0x10c   :  { %1162 = vmatpush.bf16.msra.mxu3 %v1114_v60  ;;  %v1108_v28 = vsel %vm195_vm1, %v1096_v39, 0  ;;  %v1105_v45 = vsel %vm195_vm1, %v1095_v54, 0 }
 0x10d   :  { %1136 = vmatpush.bf16.msra.mxu1 %v1108_v28  ;;  %1123 = vmatpush.bf16.msra.mxu0 %v1105_v45  ;;  %v1482_v45 = vpack.c.b16 %v1478_v2, %v1478_v2 }
 0x119   :  { %2083 = vmatmul.msk.bf16.vlgmr.msrb.gmra.mxu0 %vm191_vm2, %v2082_v47  ;;  %2084 = vmatmul.msk.bf16.vlgmr.msrb.gmra.mxu1 %vm191_vm2, %v2082_v47 }
 0x11a   :  { %2085 = vmatmul.msk.bf16.vlgmr.msrb.gmra.mxu2 %vm191_vm2, %v2082_v47  ;;  %1197 = vmatpush.bf16.msrb.mxu0 %v1182_v31  ;;  %v1336_v57 = vpop.permute.xlu0 %1335  ;;  %v1488_v31 = vpack.i.b16 %v1480_v52, %v1480_v52 }
 0x11b   :  { %2086 = vmatmul.msk.bf16.vlgmr.msrb.gmra.mxu3 %vm191_vm2, %v2082_v47  ;;  %1223 = vmatpush.bf16.msrb.mxu2 %v1186_v18  ;;  %v1339_v59 = vsel %vm917_vm6, %v1334_v62, %v1336_v57 }
 0x11c   :  { %1236 = vmatpush.bf16.msrb.mxu3 %v1188_v56  ;;  %1210 = vmatpush.bf16.msrb.mxu1 %v1184_v34  ;;  %v1354_v13 = vunpack.c.l.bf16 %v1339_v59  ;;  %v2576_v41 = vpop.permute.xlu2 %1452 }
 0x11e   :  { %v230_v61 = vpop.f32.mrf.mxu1  ;;  %v1358_v8 = vmul.f32 %v1354_v13, %v2483_v53 }
 0x120   :  { %v1362_v53 = vpack.c.bf16 %v1358_v8, %v1358_v8 }
 0x122   :  { %v1332_v26 = vpop.permute.xlu0 %1331  ;;  %v1376_v58 = vsel %vm195_vm1, %v1362_v53, 0 }
 0x123   :  { %v1338_v15 = vsel %vm917_vm6, %v1332_v26, %v1334_v62  ;;  %v1337_v16 = vsel %vm917_vm6, %v1330_v42, %v1332_v26  ;;  %v1490_v62 = vperm.slane %v1488_v31, 3 }
 0x124   :  { %v1353_v0 = vunpack.c.l.bf16 %v1338_v15  ;;  %v1352_v30 = vunpack.c.l.bf16 %v1337_v16  ;;  %v1449_v60 = vpop.permute.xlu2 %1448 }
 0x125   :  { %v1504_v13 = vunpack.c.l.bf16 %v1490_v62 }
 0x126   :  { %v217_v32 = vpop.f32.mrf.mxu0  ;;  %v232_v40 = vpop.f32.mrf.mxu1  ;;  %v1357_v20 = vmul.f32 %v1353_v0, %v2485_v55  ;;  %v1356_v21 = vmul.f32 %v1352_v30, %v2493_v63  ;;  %v2092_v55 = vld [vmem:[%s2716_s1 + $0x24] sm:$0xf]  ;;  %v1494_v63 = vperm.slane %v1492_v9, 3 }
 0x128   :  { %v1361_v24 = vpack.c.bf16 %v1357_v20, %v1357_v20  ;;  %v1360_v14 = vpack.c.bf16 %v1356_v21, %v1356_v21  ;;  %v1505_v18 = vunpack.c.l.bf16 %v1494_v63  ;;  %v1622_v20 = vld [vmem:[%s2718_s3] sm:$0x88] }
 0x129   :  { %2088 = vmatmul.msk.bf16.vlgmr.msra.gmra.mxu0 %vm191_vm2, %v2087_v3  ;;  %2089 = vmatmul.msk.bf16.vlgmr.msra.gmra.mxu1 %vm191_vm2, %v2087_v3  ;;  %v1627_v21 = vunpack.c.h.b16 %v1622_v20 }
 0x12a   :  { %2090 = vmatmul.msk.bf16.vlgmr.msra.gmra.mxu2 %vm191_vm2, %v2087_v3  ;;  %1271 = vmatpush.bf16.msra.mxu0 %v1256_v1  ;;  %v1373_v36 = vsel %vm195_vm1, %v1361_v24, 0  ;;  %v1370_v47 = vsel %vm195_vm1, %v1360_v14, 0 }
 0x12b   :  { %2091 = vmatmul.msk.bf16.vlgmr.msra.gmra.mxu3 %vm191_vm2, %v2087_v3  ;;  %1297 = vmatpush.bf16.msra.mxu2 %v1260_v4 }
 0x12c   :  { %1310 = vmatpush.bf16.msra.mxu3 %v1262_v5  ;;  %v2565_v37 = vpop.f32.mrf.mxu2  ;;  %1284 = vmatpush.bf16.msra.mxu1 %v1258_v6 }
 0x12d   :  { %v2567_v38 = vpop.f32.mrf.mxu3  ;;  %v1347_v10 = vpop.permute.xlu1 %1346 }
 0x12e   :  { %v219_v7 = vpop.f32.mrf.mxu0  ;;  %v1350_v29 = vsel %vm917_vm6, %v1336_v57, %v1347_v10 }
 0x12f   :  { %v1355_v17 = vunpack.c.l.bf16 %v1350_v29  ;;  %v1623_v7 = vld [vmem:[%s2718_s3 + $0x8] sm:$0x88] }
 0x130   :  { %v1628_v26 = vunpack.c.l.b16 %v1623_v7 }
 0x131   :  { %v1359_v22 = vmul.f32 %v1355_v17, %v2488_v33  ;;  %v1475_v33 = vunpack.c.l.b16 %v1471_v44 }
 0x132   :  { %v1632_v29 = vpack.c.b16 %v1628_v26, %v1628_v26 }
 0x133   :  { %v1363_v43 = vpack.c.bf16 %v1359_v22, %v1359_v22  ;;  %v1479_v39 = vpack.c.b16 %v1475_v33, %v1475_v33  ;;  %v1629_v22 = vunpack.c.h.b16 %v1623_v7 }
 0x134   :  { %v245_v23 = vpop.f32.mrf.mxu2  ;;  %v1645_v53 = vshrl.u32 %v1632_v29, 16 }
 0x135   :  { %v258_v27 = vpop.f32.mrf.mxu3  ;;  %v1451_v51 = vpop.permute.xlu1 %1450  ;;  %v1379_v54 = vsel %vm195_vm1, %v1363_v43, 0  ;;  %v1484_v34 = vpack.i.b16 %v1479_v39, %v1479_v39  ;;  %v1626_v43 = vunpack.c.l.b16 %v1622_v20  ;;  %v1633_v63 = vpack.c.b16 %v1629_v22, %v1629_v22  ;;  %v2102_v22 = vld [vmem:[%s2716_s1 + $0x2c] sm:$0xf] }
 0x136   :  { %v284_v48 = vpop.f32.mrf.mxu0  ;;  %v297_v49 = vpop.f32.mrf.mxu1  ;;  %v1457_v11 = vsel %vm1454_vm7, %v1451_v51, %v2576_v41  ;;  %v1456_v28 = vsel %vm1454_vm7, %v1449_v60, %v1451_v51  ;;  %v1646_v14 = vpack.i.b16 %v1645_v53, %v1645_v53 }
 0x137   :  { %v2587_v50 = vadd.f32 %v284_v48, %v217_v32  ;;  %v2589_v35 = vadd.f32 %v297_v49, %v230_v61  ;;  %v1501_v56 = vunpack.c.l.bf16 %v1457_v11  ;;  %v1496_v61 = vpack.i.b16 %v1482_v45, %v1482_v45 }
 0x138   :  { %v1500_v32 = vunpack.c.l.bf16 %v1456_v28  ;;  %v1486_v3 = vperm.slane %v1484_v34, 3  ;;  %v1648_v11 = vperm.slane %v1646_v14, 3  ;;  %v1630_v52 = vpack.c.b16 %v1626_v43, %v1626_v43 }
 0x139   :  { %2093 = vmatmul.msk.bf16.vlgmr.msrb.gmra.mxu0 %vm191_vm2, %v2092_v55  ;;  %2094 = vmatmul.msk.bf16.vlgmr.msrb.gmra.mxu1 %vm191_vm2, %v2092_v55  ;;  %v1498_v42 = vperm.slane %v1496_v61, 3  ;;  %v1509_v6 = vmul.f32 %v1505_v18, %v1501_v56 }
 0x13a   :  { %2095 = vmatmul.msk.bf16.vlgmr.msrb.gmra.mxu2 %vm191_vm2, %v2092_v55  ;;  %1401 = vmatpush.bf16.msrb.mxu1 %v1373_v36  ;;  %v1503_v8 = vunpack.c.l.bf16 %v1486_v3  ;;  %v1508_v10 = vmul.f32 %v1504_v13, %v1500_v32  ;;  %v1660_v31 = vunpack.c.l.bf16 %v1648_v11 }
 0x13b   :  { %2096 = vmatmul.msk.bf16.vlgmr.msrb.gmra.mxu3 %vm191_vm2, %v2092_v55  ;;  %1414 = vmatpush.bf16.msrb.mxu2 %v1376_v58  ;;  %v1631_v55 = vpack.c.b16 %v1627_v21, %v1627_v21  ;;  %v1616_v58 = vpop.permute.xlu2 %1615 }
 0x13c   :  { %1427 = vmatpush.bf16.msrb.mxu3 %v1379_v54  ;;  %1388 = vmatpush.bf16.msrb.mxu0 %v1370_v47  ;;  %v1512_v30 = vpack.c.bf16 %v1508_v10, %v1508_v10  ;;  %v1635_v47 = vshrl.u32 %v1630_v52, 16 }
 0x13d   :  { %v310_v40 = vpop.f32.mrf.mxu2  ;;  %v1447_v25 = vpop.permute.xlu1 %1446  ;;  %v1640_v36 = vshrl.u32 %v1631_v55, 16 }
 0x13e   :  { %v323_v57 = vpop.f32.mrf.mxu3  ;;  %v2603_v59 = vadd.f32 %v310_v40, %v2565_v37  ;;  %v286_v5 = vpop.f32.mrf.mxu0  ;;  %v1455_v12 = vsel %vm1454_vm7, %v1447_v25, %v1449_v60  ;;  %v1506_v37 = vunpack.c.l.bf16 %v1498_v42  ;;  %v1524_v51 = vsel %vm195_vm1, %v1512_v30, 0 }
 0x13f   :  { %v2606_v4 = vadd.f32 %v323_v57, %v2567_v38  ;;  %v299_v1 = vpop.f32.mrf.mxu1  ;;  %v1499_v15 = vunpack.c.l.bf16 %v1455_v12  ;;  %v1465_v16 = vpop.permute.xlu0 %1464  ;;  %v1513_v38 = vpack.c.bf16 %v1509_v6, %v1509_v6  ;;  %v1650_v60 = vshrl.u32 %v1633_v63, 16 }
 0x140   :  { %v1469_v0 = vsel %vm1454_vm7, %v2576_v41, %v1465_v16  ;;  %v2097_v41 = vld [vmem:[%s2716_s1 + $0x28] sm:$0xf]  ;;  %v1641_v45 = vpack.i.b16 %v1640_v36, %v1640_v36  ;;  %v1636_v61 = vpack.i.b16 %v1635_v47, %v1635_v47 }
 0x141   :  { %v1507_v17 = vmul.f32 %v1503_v8, %v1499_v15  ;;  %v1502_v19 = vunpack.c.l.bf16 %v1469_v0  ;;  %v1527_v49 = vsel %vm195_vm1, %v1513_v38, 0  ;;  %v1651_v18 = vpack.i.b16 %v1650_v60, %v1650_v60 }
 0x142   :  { %v1643_v40 = vperm.slane %v1641_v45, 3  ;;  %v1638_v13 = vperm.slane %v1636_v61, 3 }
 0x143   :  { %v1511_v27 = vpack.c.bf16 %v1507_v17, %v1507_v17  ;;  %v1510_v24 = vmul.f32 %v1506_v37, %v1502_v19  ;;  %v1653_v62 = vperm.slane %v1651_v18, 3  ;;  %v1757_v8 = vpop.permute.xlu2 %1756 }
 0x144   :  { %v2636_v26 = vunpack.c.l.bf16 %v1643_v40  ;;  %v1658_v12 = vunpack.c.l.bf16 %v1638_v13  ;;  %v2107_v40 = vld [vmem:[%s2716_s1 + $0x30] sm:$0xf] }
 0x145   :  { %v312_v9 = vpop.f32.mrf.mxu2  ;;  %v1514_v2 = vpack.c.bf16 %v1510_v24, %v1510_v24  ;;  %v1604_v39 = vpop.permute.xlu1 %1603  ;;  %v2634_v7 = vunpack.c.l.bf16 %v1653_v62  ;;  %v1894_v62 = vld [vmem:[%s2718_s3 + $0x10] sm:$0x11] }
 0x146   :  { %v325_v23 = vpop.f32.mrf.mxu3  ;;  %v397_v44 = vpop.f32.mrf.mxu0  ;;  %v1620_v56 = vsel %vm1605_vm8, %v1604_v39, %v1616_v58 }
 0x147   :  { %v410_v48 = vpop.f32.mrf.mxu1  ;;  %v440_v46 = vadd.f32 %v397_v44, %v2587_v50  ;;  %v1602_v54 = vpop.permute.xlu0 %1601  ;;  %v1530_v28 = vsel %vm195_vm1, %v1514_v2, 0  ;;  %v1521_v50 = vsel %vm195_vm1, %v1511_v27, 0  ;;  %v1657_v57 = vunpack.c.l.bf16 %v1620_v56 }
 0x148   :  { %v441_v33 = vadd.f32 %v410_v48, %v2589_v35  ;;  %v1608_v35 = vsel %vm1605_vm8, %v1602_v54, %v1604_v39 }
 0x149   :  { %2098 = vmatmul.msk.bf16.vlgmr.msra.gmra.mxu0 %vm191_vm2, %v2097_v41  ;;  %2099 = vmatmul.msk.bf16.vlgmr.msra.gmra.mxu1 %vm191_vm2, %v2097_v41  ;;  %v1656_v34 = vunpack.c.l.bf16 %v1608_v35  ;;  %v1665_v37 = vmul.f32 %v2634_v7, %v1657_v57 }
 0x14a   :  { %2100 = vmatmul.msk.bf16.vlgmr.msra.gmra.mxu2 %vm191_vm2, %v2097_v41  ;;  %1552 = vmatpush.bf16.msra.mxu1 %v1524_v51 }
 0x14b   :  { %2101 = vmatmul.msk.bf16.vlgmr.msra.gmra.mxu3 %vm191_vm2, %v2097_v41  ;;  %1565 = vmatpush.bf16.msra.mxu2 %v1527_v49  ;;  %v1664_v25 = vmul.f32 %v1660_v31, %v1656_v34  ;;  %v1669_v53 = vpack.c.bf16 %v1665_v37, %v1665_v37  ;;  %v1753_v43 = vpop.permute.xlu2 %1752 }
 0x14c   :  { %1578 = vmatpush.bf16.msra.mxu3 %v1530_v28  ;;  %1539 = vmatpush.bf16.msra.mxu0 %v1521_v50 }
 0x14d   :  { %v423_v32 = vpop.f32.mrf.mxu2  ;;  %v1668_v38 = vpack.c.bf16 %v1664_v25, %v1664_v25  ;;  %v1685_v48 = vsel %vm195_vm1, %v1669_v53, 0 }
 0x14e   :  { %v436_v3 = vpop.f32.mrf.mxu3  ;;  %v442_v42 = vadd.f32 %v423_v32, %v2603_v59  ;;  %v399_v1 = vpop.f32.mrf.mxu0 }
 0x14f   :  { %v443_v5 = vadd.f32 %v436_v3, %v2606_v4  ;;  %v412_v6 = vpop.f32.mrf.mxu1  ;;  %v1600_v10 = vpop.permute.xlu1 %1599  ;;  %v1682_v14 = vsel %vm195_vm1, %v1668_v38, 0  ;;  %v1899_v1 = vunpack.c.h.b16 %v1894_v62 }
 0x150   :  { %v1598_v15 = vpop.permute.xlu0 %1597  ;;  %v1607_v16 = vsel %vm1605_vm8, %v1600_v10, %v1602_v54 }
 0x151   :  { %v1606_v59 = vsel %vm1605_vm8, %v1598_v15, %v1600_v10  ;;  %v1655_v29 = vunpack.c.l.bf16 %v1607_v16  ;;  %v1903_v16 = vpack.c.b16 %v1899_v1, %v1899_v1 }
 0x152   :  { %v1654_v4 = vunpack.c.l.bf16 %v1606_v59 }
 0x153   :  { %v1663_v17 = vmul.f32 %v2636_v26, %v1655_v29  ;;  %v2654_v39 = vpop.permute.xlu2 %1875 }
 0x154   :  { %v1662_v19 = vmul.f32 %v1658_v12, %v1654_v4  ;;  %v1898_v4 = vunpack.c.l.b16 %v1894_v62 }
 0x155   :  { %v425_v0 = vpop.f32.mrf.mxu2  ;;  %v1667_v27 = vpack.c.bf16 %v1663_v17, %v1663_v17 }
 0x156   :  { %v438_v30 = vpop.f32.mrf.mxu3  ;;  %v548_v20 = vpop.f32.mrf.mxu0  ;;  %v1666_v24 = vpack.c.bf16 %v1662_v19, %v1662_v19 }
 0x157   :  { %v561_v21 = vpop.f32.mrf.mxu1  ;;  %v591_v9 = vadd.f32 %v548_v20, %v440_v46  ;;  %v1679_v44 = vsel %vm195_vm1, %v1667_v27, 0  ;;  %v1902_v30 = vpack.c.b16 %v1898_v4, %v1898_v4  ;;  %v2117_v4 = vld [vmem:[%s2716_s1 + $0x38] sm:$0xf] }
 0x158   :  { %v592_v23 = vadd.f32 %v561_v21, %v441_v33  ;;  %v1676_v41 = vsel %vm195_vm1, %v1666_v24, 0  ;;  %v1759_v49 = vpop.permute.xlu0 %1758 }
 0x159   :  { %2103 = vmatmul.msk.bf16.vlgmr.msrb.gmra.mxu0 %vm191_vm2, %v2102_v22  ;;  %2104 = vmatmul.msk.bf16.vlgmr.msrb.gmra.mxu1 %vm191_vm2, %v2102_v22  ;;  %v1762_v55 = vsel %vm1605_vm8, %v1757_v8, %v1759_v49 }
 0x15a   :  { %2105 = vmatmul.msk.bf16.vlgmr.msrb.gmra.mxu2 %vm191_vm2, %v2102_v22  ;;  %1707 = vmatpush.bf16.msrb.mxu1 %v1679_v44  ;;  %v1777_v63 = vunpack.c.l.bf16 %v1762_v55 }
 0x15b   :  { %2106 = vmatmul.msk.bf16.vlgmr.msrb.gmra.mxu3 %vm191_vm2, %v2102_v22  ;;  %1720 = vmatpush.bf16.msrb.mxu2 %v1682_v14  ;;  %v1872_v53 = vpop.permute.xlu2 %1871 }
 0x15c   :  { %1733 = vmatpush.bf16.msrb.mxu3 %v1685_v48  ;;  %1694 = vmatpush.bf16.msrb.mxu0 %v1676_v41  ;;  %v1781_v36 = vmul.f32 %v1777_v63, %v1660_v31  ;;  %v1895_v31 = vld [vmem:[%s2718_s3 + $0x18] sm:$0x11]  ;;  %v1907_v48 = vpack.i.b16 %v1902_v30, %v1902_v30 }
 0x15d   :  { %v574_v46 = vpop.f32.mrf.mxu2  ;;  %v1901_v25 = vunpack.c.h.b16 %v1895_v31 }
 0x15e   :  { %v587_v33 = vpop.f32.mrf.mxu3  ;;  %v593_v2 = vadd.f32 %v574_v46, %v442_v42  ;;  %v550_v58 = vpop.f32.mrf.mxu0  ;;  %v1785_v52 = vpack.c.bf16 %v1781_v36, %v1781_v36 }
 0x15f   :  { %v594_v51 = vadd.f32 %v587_v33, %v443_v5  ;;  %v563_v11 = vpop.f32.mrf.mxu1  ;;  %v1770_v50 = vpop.permute.xlu1 %1769  ;;  %v1900_v5 = vunpack.c.l.b16 %v1895_v31  ;;  %v1905_v29 = vpack.c.b16 %v1901_v25, %v1901_v25 }
 0x160   :  { %v1755_v60 = vpop.permute.xlu0 %1754  ;;  %v1773_v47 = vsel %vm1605_vm8, %v1759_v49, %v1770_v50  ;;  %v1799_v61 = vsel %vm195_vm1, %v1785_v52, 0  ;;  %v1909_v11 = vperm.slane %v1907_v48, 0 }
 0x161   :  { %v1761_v54 = vsel %vm1605_vm8, %v1755_v60, %v1757_v8  ;;  %v1760_v28 = vsel %vm1605_vm8, %v1753_v43, %v1755_v60  ;;  %v1778_v34 = vunpack.c.l.bf16 %v1773_v47  ;;  %v1904_v37 = vpack.c.b16 %v1900_v5, %v1900_v5 }
 0x162   :  { %v1776_v35 = vunpack.c.l.bf16 %v1761_v54  ;;  %v1775_v45 = vunpack.c.l.bf16 %v1760_v28  ;;  %v1919_v20 = vpack.i.b16 %v1905_v29, %v1905_v29 }
 0x163   :  { %v1782_v8 = vmul.f32 %v1778_v34, %v2634_v7  ;;  %v1911_v7 = vpack.i.b16 %v1903_v16, %v1903_v16  ;;  %v1926_v34 = vunpack.c.l.bf16 %v1909_v11 }
 0x164   :  { %v1780_v57 = vmul.f32 %v1776_v35, %v2636_v26  ;;  %v1779_v42 = vmul.f32 %v1775_v45, %v1658_v12  ;;  %v1915_v12 = vpack.i.b16 %v1904_v37, %v1904_v37  ;;  %v1921_v55 = vperm.slane %v1919_v20, 0  ;;  %v2112_v45 = vld [vmem:[%s2716_s1 + $0x34] sm:$0xf] }
 0x165   :  { %v576_v18 = vpop.f32.mrf.mxu2  ;;  %v1786_v59 = vpack.c.bf16 %v1782_v8, %v1782_v8  ;;  %v1913_v19 = vperm.slane %v1911_v7, 0 }
 0x166   :  { %v589_v56 = vpop.f32.mrf.mxu3  ;;  %v704_v32 = vpop.f32.mrf.mxu0  ;;  %v1784_v10 = vpack.c.bf16 %v1780_v57, %v1780_v57  ;;  %v1783_v15 = vpack.c.bf16 %v1779_v42, %v1779_v42  ;;  %v1917_v17 = vperm.slane %v1915_v12, 0  ;;  %v1929_v36 = vunpack.c.l.bf16 %v1921_v55  ;;  %v2011_v12 = vld [vmem:[%s2717_s2] sm:$0xff] }
 0x167   :  { %v717_v3 = vpop.f32.mrf.mxu1  ;;  %v747_v6 = vadd.f32 %v704_v32, %v591_v9  ;;  %v1802_v0 = vsel %vm195_vm1, %v1786_v59, 0  ;;  %v1927_v44 = vunpack.c.l.bf16 %v1913_v19 }
 0x168   :  { %v748_v13 = vadd.f32 %v717_v3, %v592_v23  ;;  %v1796_v26 = vsel %vm195_vm1, %v1784_v10, 0  ;;  %v1793_v38 = vsel %vm195_vm1, %v1783_v15, 0  ;;  %v1928_v14 = vunpack.c.l.bf16 %v1917_v17 }
 0x169   :  { %2108 = vmatmul.msk.bf16.vlgmr.msra.gmra.mxu0 %vm191_vm2, %v2107_v40  ;;  %2109 = vmatmul.msk.bf16.vlgmr.msra.gmra.mxu1 %vm191_vm2, %v2107_v40  ;;  %v1874_v43 = vpop.permute.xlu1 %1873 }
 0x16a   :  { %2110 = vmatmul.msk.bf16.vlgmr.msra.gmra.mxu2 %vm191_vm2, %v2107_v40  ;;  %1824 = vmatpush.bf16.msra.mxu1 %v1796_v26  ;;  %v1880_v41 = vsel %vm1877_vm9, %v1874_v43, %v2654_v39  ;;  %v1879_v49 = vsel %vm1877_vm9, %v1872_v53, %v1874_v43  ;;  %v2172_v26 = vmov 0  }
 0x16b   :  { %2111 = vmatmul.msk.bf16.vlgmr.msra.gmra.mxu3 %vm191_vm2, %v2107_v40  ;;  %1837 = vmatpush.bf16.msra.mxu2 %v1799_v61  ;;  %v1924_v63 = vunpack.c.l.bf16 %v1880_v41  ;;  %v1923_v46 = vunpack.c.l.bf16 %v1879_v49 }
 0x16c   :  { %1850 = vmatpush.bf16.msra.mxu3 %v1802_v0  ;;  %1811 = vmatpush.bf16.msra.mxu0 %v1793_v38 }
 0x16d   :  { %v730_v21 = vpop.f32.mrf.mxu2  ;;  %v1932_v33 = vmul.f32 %v1928_v14, %v1924_v63  ;;  %v1931_v58 = vmul.f32 %v1927_v44, %v1923_v46  ;;  %2137 = vset.pattern.permute.xlu0 %v2172_v26 }
 0x16e   :  { %v743_v22 = vpop.f32.mrf.mxu3  ;;  %v749_v9 = vadd.f32 %v730_v21, %v593_v2  ;;  %v706_v27 = vpop.f32.mrf.mxu0  ;;  %2014 = vperm.xlu0 %2137, %v2011_v12  }
 0x16f   :  { %v750_v23 = vadd.f32 %v743_v22, %v594_v51  ;;  %v719_v24 = vpop.f32.mrf.mxu1  ;;  %v1936_v60 = vpack.c.bf16 %v1932_v33, %v1932_v33  ;;  %v1935_v54 = vpack.c.bf16 %v1931_v58, %v1931_v58  ;;  %v2122_v27 = vld [vmem:[%s2716_s1 + $0x3c] sm:$0xf]  ;;  %s2173_s1 = smov [#allocation2]  }
 0x170   :  { %s2034_s14 = sshll.u32 %s2173_s1, 4  ;;  %s2035_s14 = int_to_ptr.vmem [resolvable:$true] %s2034_s14 }
 0x171   :  { %v1888_v2 = vpop.permute.xlu0 %1887  ;;  %v1870_v61 = vpop.permute.xlu1 %1869  ;;  %v1947_v32 = vsel %vm195_vm1, %v1935_v54, 0  ;;  %v1950_v3 = vsel %vm195_vm1, %v1936_v60, 0 }
 0x172   :  { %v1892_v28 = vsel %vm1877_vm9, %v2654_v39, %v1888_v2  ;;  %v1878_v62 = vsel %vm1877_vm9, %v1870_v61, %v1872_v53 }
 0x173   :  { %v1925_v47 = vunpack.c.l.bf16 %v1892_v28  ;;  %v1922_v39 = vunpack.c.l.bf16 %v1878_v62 }
 0x175   :  { %v732_v51 = vpop.f32.mrf.mxu2  ;;  %v1933_v31 = vmul.f32 %v1929_v36, %v1925_v47  ;;  %v1930_v57 = vmul.f32 %v1926_v34, %v1922_v39 }
 0x176   :  { %v745_v52 = vpop.f32.mrf.mxu3  ;;  %v779_v50 = vpop.f32.mrf.mxu0 }
 0x177   :  { %v792_v35 = vpop.f32.mrf.mxu1  ;;  %v822_v18 = vadd.f32 %v779_v50, %v747_v6  ;;  %v1937_v40 = vpack.c.bf16 %v1933_v31, %v1933_v31  ;;  %v1934_v6 = vpack.c.bf16 %v1930_v57, %v1930_v57 }
 0x178   :  { %v823_v56 = vadd.f32 %v792_v35, %v748_v13 }
 0x179   :  { %2113 = vmatmul.msk.bf16.vlgmr.msrb.gmra.mxu0 %vm191_vm2, %v2112_v45  ;;  %2114 = vmatmul.msk.bf16.vlgmr.msrb.gmra.mxu1 %vm191_vm2, %v2112_v45  ;;  %v1953_v42 = vsel %vm195_vm1, %v1937_v40, 0  ;;  %v1944_v15 = vsel %vm195_vm1, %v1934_v6, 0 }
 0x17a   :  { %2115 = vmatmul.msk.bf16.vlgmr.msrb.gmra.mxu2 %vm191_vm2, %v2112_v45  ;;  %1975 = vmatpush.bf16.msrb.mxu1 %v1947_v32 }
 0x17b   :  { %2116 = vmatmul.msk.bf16.vlgmr.msrb.gmra.mxu3 %vm191_vm2, %v2112_v45  ;;  %1988 = vmatpush.bf16.msrb.mxu2 %v1950_v3 }
 0x17c   :  { %2001 = vmatpush.bf16.msrb.mxu3 %v1953_v42  ;;  %1962 = vmatpush.bf16.msrb.mxu0 %v1944_v15 }
 0x17d   :  { %v805_v5 = vpop.f32.mrf.mxu2 }
 0x17e   :  { %v818_v1 = vpop.f32.mrf.mxu3  ;;  %v824_v13 = vadd.f32 %v805_v5, %v749_v9  ;;  %v781_v25 = vpop.f32.mrf.mxu0 }
 0x17f   :  { %v825_v8 = vadd.f32 %v818_v1, %v750_v23  ;;  %v794_v10 = vpop.f32.mrf.mxu1 }
 0x185   :  { %v807_v37 = vpop.f32.mrf.mxu2 }
 0x186   :  { %v820_v16 = vpop.f32.mrf.mxu3  ;;  %v853_v59 = vpop.f32.mrf.mxu0 }
 0x187   :  { %v866_v29 = vpop.f32.mrf.mxu1  ;;  %v896_v7 = vadd.f32 %v853_v59, %v822_v18 }
 0x188   :  { %v897_v38 = vadd.f32 %v866_v29, %v823_v56 }
 0x189   :  { %2118 = vmatmul.msk.bf16.vlgmr.msra.gmra.mxu0 %vm191_vm2, %v2117_v4  ;;  %2119 = vmatmul.msk.bf16.vlgmr.msra.gmra.mxu1 %vm191_vm2, %v2117_v4 }
 0x18a   :  { %2120 = vmatmul.msk.bf16.vlgmr.msra.gmra.mxu2 %vm191_vm2, %v2117_v4 }
 0x18b   :  { %2121 = vmatmul.msk.bf16.vlgmr.msra.gmra.mxu3 %vm191_vm2, %v2117_v4 }
 0x18d   :  { %v879_v0 = vpop.f32.mrf.mxu2 }
 0x18e   :  { %v892_v30 = vpop.f32.mrf.mxu3  ;;  %v898_v17 = vadd.f32 %v879_v0, %v824_v13  ;;  %v855_v53 = vpop.f32.mrf.mxu0 }
 0x18f   :  { %v899_v19 = vadd.f32 %v892_v30, %v825_v8  ;;  %v868_v20 = vpop.f32.mrf.mxu1 }
 0x195   :  { %v881_v21 = vpop.f32.mrf.mxu2 }
 0x196   :  { %v894_v22 = vpop.f32.mrf.mxu3  ;;  %v1008_v9 = vpop.f32.mrf.mxu0 }
 0x197   :  { %v1021_v23 = vpop.f32.mrf.mxu1  ;;  %v1051_v24 = vadd.f32 %v1008_v9, %v896_v7 }
 0x198   :  { %v1052_v14 = vadd.f32 %v1021_v23, %v897_v38 }
 0x199   :  { %2123 = vmatmul.msk.bf16.vlgmr.msrb.gmra.mxu0 %vm191_vm2, %v2122_v27  ;;  %2124 = vmatmul.msk.bf16.vlgmr.msrb.gmra.mxu1 %vm191_vm2, %v2122_v27 }
 0x19a   :  { %2125 = vmatmul.msk.bf16.vlgmr.msrb.gmra.mxu2 %vm191_vm2, %v2122_v27 }
 0x19b   :  { %2126 = vmatmul.msk.bf16.vlgmr.msrb.gmra.mxu3 %vm191_vm2, %v2122_v27 }
 0x19d   :  { %v1034_v43 = vpop.f32.mrf.mxu2 }
 0x19e   :  { %v1047_v44 = vpop.f32.mrf.mxu3  ;;  %v1053_v48 = vadd.f32 %v1034_v43, %v898_v17  ;;  %v1010_v49 = vpop.f32.mrf.mxu0 }
 0x19f   :  { %v1054_v41 = vadd.f32 %v1047_v44, %v899_v19  ;;  %v1023_v55 = vpop.f32.mrf.mxu1 }
 0x1a5   :  { %v1036_v63 = vpop.f32.mrf.mxu2 }
 0x1a6   :  { %v1049_v46 = vpop.f32.mrf.mxu3  ;;  %v1125_v58 = vpop.f32.mrf.mxu0 }
 0x1a7   :  { %v1138_v33 = vpop.f32.mrf.mxu1  ;;  %v1168_v36 = vadd.f32 %v1125_v58, %v1051_v24 }
 0x1a8   :  { %v1169_v11 = vadd.f32 %v1138_v33, %v1052_v14 }
 0x1ad   :  { %v1151_v2 = vpop.f32.mrf.mxu2 }
 0x1ae   :  { %v1164_v51 = vpop.f32.mrf.mxu3  ;;  %v1170_v52 = vadd.f32 %v1151_v2, %v1053_v48  ;;  %v1127_v54 = vpop.f32.mrf.mxu0 }
 0x1af   :  { %v1171_v60 = vadd.f32 %v1164_v51, %v1054_v41  ;;  %v1140_v28 = vpop.f32.mrf.mxu1 }
 0x1b5   :  { %v1153_v50 = vpop.f32.mrf.mxu2 }
 0x1b6   :  { %v1166_v35 = vpop.f32.mrf.mxu3  ;;  %v1199_v45 = vpop.f32.mrf.mxu0 }
 0x1b7   :  { %v1212_v47 = vpop.f32.mrf.mxu1  ;;  %v1242_v18 = vadd.f32 %v1199_v45, %v1168_v36 }
 0x1b8   :  { %v1243_v56 = vadd.f32 %v1212_v47, %v1169_v11 }
 0x1bd   :  { %v1225_v34 = vpop.f32.mrf.mxu2 }
 0x1be   :  { %v1238_v61 = vpop.f32.mrf.mxu3  ;;  %v1244_v31 = vadd.f32 %v1225_v34, %v1170_v52  ;;  %v1201_v32 = vpop.f32.mrf.mxu0 }
 0x1bf   :  { %v1245_v62 = vadd.f32 %v1238_v61, %v1171_v60  ;;  %v1214_v3 = vpop.f32.mrf.mxu1 }
 0x1c5   :  { %v1227_v39 = vpop.f32.mrf.mxu2 }
 0x1c6   :  { %v1240_v40 = vpop.f32.mrf.mxu3  ;;  %v1273_v57 = vpop.f32.mrf.mxu0 }
 0x1c7   :  { %v1286_v42 = vpop.f32.mrf.mxu1  ;;  %v1316_v5 = vadd.f32 %v1273_v57, %v1242_v18 }
 0x1c8   :  { %v1317_v1 = vadd.f32 %v1286_v42, %v1243_v56 }
 0x1cd   :  { %v1299_v6 = vpop.f32.mrf.mxu2 }
 0x1ce   :  { %v1312_v13 = vpop.f32.mrf.mxu3  ;;  %v1318_v8 = vadd.f32 %v1299_v6, %v1244_v31  ;;  %v1275_v10 = vpop.f32.mrf.mxu0 }
 0x1cf   :  { %v1319_v25 = vadd.f32 %v1312_v13, %v1245_v62  ;;  %v1288_v15 = vpop.f32.mrf.mxu1 }
 0x1d5   :  { %v1301_v37 = vpop.f32.mrf.mxu2 }
 0x1d6   :  { %v1314_v16 = vpop.f32.mrf.mxu3  ;;  %v1390_v59 = vpop.f32.mrf.mxu0 }
 0x1d7   :  { %v1403_v29 = vpop.f32.mrf.mxu1  ;;  %v1433_v11 = vadd.f32 %v1390_v59, %v1316_v5 }
 0x1d8   :  { %v1434_v36 = vadd.f32 %v1403_v29, %v1317_v1 }
 0x1dd   :  { %v1416_v4 = vpop.f32.mrf.mxu2 }
 0x1de   :  { %v1429_v26 = vpop.f32.mrf.mxu3  ;;  %v1392_v12 = vpop.f32.mrf.mxu0  ;;  %v1435_v47 = vadd.f32 %v1416_v4, %v1318_v8 }
 0x1df   :  { %v1405_v7 = vpop.f32.mrf.mxu1  ;;  %v1436_v18 = vadd.f32 %v1429_v26, %v1319_v25 }
 0x1e0   :  { %v2015_v54 = vpop.permute.xlu0 %2014 }
 0x1e5   :  { %v1418_v38 = vpop.f32.mrf.mxu2 }
 0x1e6   :  { %v1431_v0 = vpop.f32.mrf.mxu3  ;;  %v1541_v30 = vpop.f32.mrf.mxu0 }
 0x1e7   :  { %v1554_v17 = vpop.f32.mrf.mxu1  ;;  %v1584_v2 = vadd.f32 %v1541_v30, %v1433_v11 }
 0x1e8   :  { %v1585_v51 = vadd.f32 %v1554_v17, %v1434_v36 }
 0x1ed   :  { %v1567_v19 = vpop.f32.mrf.mxu2 }
 0x1ee   :  { %v1580_v53 = vpop.f32.mrf.mxu3  ;;  %v1543_v20 = vpop.f32.mrf.mxu0  ;;  %v1586_v62 = vadd.f32 %v1567_v19, %v1435_v47 }
 0x1ef   :  { %v1556_v21 = vpop.f32.mrf.mxu1  ;;  %v1587_v32 = vadd.f32 %v1580_v53, %v1436_v18 }
 0x1f5   :  { %v1569_v22 = vpop.f32.mrf.mxu2 }
 0x1f6   :  { %v1582_v9 = vpop.f32.mrf.mxu3  ;;  %v1696_v23 = vpop.f32.mrf.mxu0 }
 0x1f7   :  { %v1709_v27 = vpop.f32.mrf.mxu1  ;;  %v1739_v52 = vadd.f32 %v1696_v23, %v1584_v2 }
 0x1f8   :  { %v1740_v60 = vadd.f32 %v1709_v27, %v1585_v51 }
 0x1fd   :  { %v1722_v24 = vpop.f32.mrf.mxu2 }
 0x1fe   :  { %v1735_v14 = vpop.f32.mrf.mxu3  ;;  %v1698_v43 = vpop.f32.mrf.mxu0  ;;  %v1741_v40 = vadd.f32 %v1722_v24, %v1586_v62 }
 0x1ff   :  { %v1711_v44 = vpop.f32.mrf.mxu1  ;;  %v1742_v57 = vadd.f32 %v1735_v14, %v1587_v32 }
 0x205   :  { %v1724_v48 = vpop.f32.mrf.mxu2 }
 0x206   :  { %v1737_v41 = vpop.f32.mrf.mxu3  ;;  %v1813_v49 = vpop.f32.mrf.mxu0 }
 0x207   :  { %v1826_v55 = vpop.f32.mrf.mxu1  ;;  %v1856_v28 = vadd.f32 %v1813_v49, %v1739_v52 }
 0x208   :  { %v1857_v50 = vadd.f32 %v1826_v55, %v1740_v60 }
 0x20d   :  { %v1839_v63 = vpop.f32.mrf.mxu2 }
 0x20e   :  { %v1852_v46 = vpop.f32.mrf.mxu3  ;;  %v1815_v33 = vpop.f32.mrf.mxu0  ;;  %v1858_v1 = vadd.f32 %v1839_v63, %v1741_v40 }
 0x20f   :  { %v1828_v58 = vpop.f32.mrf.mxu1  ;;  %v1859_v6 = vadd.f32 %v1852_v46, %v1742_v57 }
 0x215   :  { %v1841_v35 = vpop.f32.mrf.mxu2 }
 0x216   :  { %v1854_v45 = vpop.f32.mrf.mxu3  ;;  %v1964_v56 = vpop.f32.mrf.mxu0 }
 0x217   :  { %v1977_v34 = vpop.f32.mrf.mxu1  ;;  %v2007_v61 = vadd.f32 %v1964_v56, %v1856_v28 }
 0x218   :  { %v2008_v31 = vadd.f32 %v1977_v34, %v1857_v50 }
 0x219   :  { %v2017_v3 = vadd.f32 %v2015_v54, %v2007_v61 }
 0x21a   :  { %v2018_v39 = vadd.f32 %v2015_v54, %v2008_v31 }
 0x21b   :  { %v2021_v42 = vmax.f32 %v2017_v3, 0.0 }
 0x21c   :  { %v2022_v5 = vmax.f32 %v2018_v39, 0.0 }
 0x21d   :  { %v1990_v10 = vpop.f32.mrf.mxu2 }
 0x21e   :  { %v2025_v13 = vpack.c.bf16 %v2022_v5, %v2021_v42  ;;  %v2003_v15 = vpop.f32.mrf.mxu3  ;;  %v2009_v37 = vadd.f32 %v1990_v10, %v1858_v1  ;;  %v1966_v25 = vpop.f32.mrf.mxu0 }
 0x21f   :  { %v2010_v8 = vadd.f32 %v2003_v15, %v1859_v6  ;;  %v1979_v16 = vpop.f32.mrf.mxu1 }
 0x220   :  { %2027 = vst [vmem:[#allocation2] sm:$0xff] %v2025_v13  ;;  %v2019_v59 = vadd.f32 %v2015_v54, %v2009_v37 }
 0x221   :  { %v2020_v29 = vadd.f32 %v2015_v54, %v2010_v8 }
 0x222   :  { %v2023_v4 = vmax.f32 %v2019_v59, 0.0 }
 0x223   :  { %v2024_v26 = vmax.f32 %v2020_v29, 0.0 }
 0x225   :  { %v2026_v12 = vpack.c.bf16 %v2024_v26, %v2023_v4  ;;  %v1992_v7 = vpop.f32.mrf.mxu2 }
 0x226   :  { %v2005_v38 = vpop.f32.mrf.mxu3 }
 0x227   :  { %2028 = vst [vmem:[#allocation2 + $0x8] sm:$0xff] %v2026_v12 }
 0x228   :  { %2039 = dma.vmem_to_hbm [thread:$0]  %s2035_s14, 256, %s2037_s17, [#allocation3]  }
 0x229   :  { %2162 = dma.done.wait [#allocation3], 256  }
 0x22a   :  { %2163 = vsyncadd [#allocation3], 4294967040 }
 0x22b   :  { %2044 = vsyncpa [#allocation3], 1 }

</bundles_post_ra>
